<compile_context>
chip_gen: v7x
topology: tpu7x:2x2x1
jax: 0.10.0
libtpu: 0.0.40
codegen_flags: <defaults>
</compile_context>

<pallas_src>
import functools

import jax
import jax.numpy as jnp
import numpy as np
from jax.experimental import pallas as pl
from jax.experimental.pallas import tpu as pltpu

H1, H2 = 512, 256              # hidden sizes of the MLP
OUT_PAD = 128                  # layer-3 output padded to a full 128-lane block
TK_STREAM = 512                # K tile for the streamed layer-1 contraction
RESIDENT_VMEM_BUDGET = 40 << 20  # conservative vs 64 MiB per-TC VMEM on v7x


def _round_up(x, m):
    return (x + m - 1) // m * m


def _leaky_relu(x, slope=0.2):
    return jnp.where(x >= 0, x, slope * x)


# --------------------------------------------------------------------------
# Kernels
# --------------------------------------------------------------------------
def _disc_kernel_resident(x_ref, w1_ref, b1_ref, w2_ref, b2_ref, w3_ref,
                          b3_ref, out_ref):
    """Fully fused 3-layer MLP; grid = (batch tiles,), W1 resident in VMEM."""
    h1 = jnp.dot(x_ref[...], w1_ref[...], preferred_element_type=jnp.float32)
    h1 = _leaky_relu(h1 + b1_ref[...])                       # (bm, 512) f32
    h2 = jnp.dot(h1.astype(jnp.bfloat16), w2_ref[...],
                 preferred_element_type=jnp.float32)
    h2 = _leaky_relu(h2 + b2_ref[...])                       # (bm, 256) f32
    h3 = jnp.dot(h2.astype(jnp.bfloat16), w3_ref[...],
                 preferred_element_type=jnp.float32) + b3_ref[...]
    out_ref[...] = 1.0 / (1.0 + jnp.exp(-h3))                # exact sigmoid


def _disc_kernel_stream(x_ref, w1_ref, b1_ref, w2_ref, b2_ref, w3_ref, b3_ref,
                        out_ref, acc_ref):
    """Grid = (batch tiles, K tiles): layer-1 contraction streamed through
    double-buffered W1 tiles with a f32 VMEM accumulator; layers 2/3 + sigmoid
    run on the last K step."""
    k = pl.program_id(1)
    partial = jnp.dot(x_ref[...], w1_ref[...],
                      preferred_element_type=jnp.float32)

    @pl.when(k == 0)
    def _():
        acc_ref[...] = partial            # first step: write, no zero-fill

    @pl.when(k != 0)
    def _():
        acc_ref[...] += partial

    @pl.when(k == pl.num_programs(1) - 1)
    def _():
        h1 = _leaky_relu(acc_ref[...] + b1_ref[...])         # (bm, 512) f32
        h2 = jnp.dot(h1.astype(jnp.bfloat16), w2_ref[...],
                     preferred_element_type=jnp.float32)
        h2 = _leaky_relu(h2 + b2_ref[...])                   # (bm, 256) f32
        h3 = jnp.dot(h2.astype(jnp.bfloat16), w3_ref[...],
                     preferred_element_type=jnp.float32) + b3_ref[...]
        out_ref[...] = 1.0 / (1.0 + jnp.exp(-h3))


# --------------------------------------------------------------------------
# One-time parameter preparation (do NOT call per forward)
# --------------------------------------------------------------------------
def prepare_params(params):
    """Cast weights to bf16 and pad to the kernel layout once; the per-call
    forward then only touches activations (the review's biggest win)."""
    d0 = params["w1"].shape[0]
    d = _round_up(d0, TK_STREAM)
    w1 = jnp.zeros((d, H1), jnp.bfloat16).at[:d0, :].set(
        params["w1"].astype(jnp.bfloat16))
    w3 = jnp.zeros((H2, OUT_PAD), jnp.bfloat16).at[:, :1].set(
        params["w3"].astype(jnp.bfloat16))
    b3 = jnp.zeros((1, OUT_PAD), jnp.float32).at[:, :1].set(
        jnp.asarray(params["b3"], jnp.float32).reshape(1, 1))
    return {
        "w1": w1,
        "b1": jnp.asarray(params["b1"], jnp.float32).reshape(1, H1),
        "w2": params["w2"].astype(jnp.bfloat16),
        "b2": jnp.asarray(params["b2"], jnp.float32).reshape(1, H2),
        "w3": w3,
        "b3": b3,
    }


# --------------------------------------------------------------------------
# Forward
# --------------------------------------------------------------------------
def _discriminator_forward(image, prepared, force_stream=False):
    """image: (B, C, H, W) float32; prepared: output of prepare_params."""
    B = image.shape[0]
    D0 = int(np.prod(image.shape[1:]))
    D = prepared["w1"].shape[0]                  # padded flattened dim
    x = image.reshape(B, D0)                     # same as torch .view(B, -1)

    # ---- batch tile: bf16 packs 16 rows per sublane group ------------------
    bm = min(256, _round_up(B, 16))
    if B >= 32:
        # v7x has 2 TensorCores: make sure the "parallel" axis has >= 2 tiles.
        while (B + bm - 1) // bm < 2 and bm > 16:
            bm = max(16, _round_up(bm // 2, 16))
    Bp = _round_up(B, bm)
    nb = Bp // bm

    # ---- choose resident-W1 vs K-streamed path (static, from shapes) -------
    fixed_bytes = (2 * (H1 * H2 + H2 * OUT_PAD) * 2       # W2/W3 (dbl-buf bf16)
                   + 2 * (H1 + H2 + OUT_PAD) * 4          # biases
                   + 2 * bm * OUT_PAD * 4)                # output tile
    resident_bytes = fixed_bytes + 2 * bm * D * 2 + 2 * D * H1 * 2
    resident = (not force_stream) and (resident_bytes <= RESIDENT_VMEM_BUDGET)

    # ---- pad activations (zero rows/cols contribute nothing) ---------------
    x_p = jnp.zeros((Bp, D), jnp.bfloat16).at[:B, :D0].set(
        x.astype(jnp.bfloat16))

    w1_bytes = D * H1 * 2
    if resident:
        kernel = _disc_kernel_resident
        grid = (nb,)
        x_spec = pl.BlockSpec((bm, D), lambda i: (i, 0))
        w1_spec = pl.BlockSpec((D, H1), lambda i: (0, 0))      # fully resident
        const = lambda i: (0, 0)
        out_spec = pl.BlockSpec((bm, OUT_PAD), lambda i: (i, 0))
        scratch = []
        semantics = ("parallel",)
        vmem_bytes = resident_bytes
        w1_traffic = w1_bytes                                   # DMA'd once
    else:
        tk = TK_STREAM
        nk = D // tk
        kernel = _disc_kernel_stream
        grid = (nb, nk)
        x_spec = pl.BlockSpec((bm, tk), lambda i, k: (i, k))
        w1_spec = pl.BlockSpec((tk, H1), lambda i, k: (k, 0))   # streamed
        const = lambda i, k: (0, 0)
        out_spec = pl.BlockSpec((bm, OUT_PAD), lambda i, k: (i, 0))
        scratch = [pltpu.VMEM((bm, H1), jnp.float32)]           # h1 accumulator
        semantics = ("parallel", "arbitrary")
        vmem_bytes = (fixed_bytes + 2 * bm * tk * 2 + 2 * tk * H1 * 2
                      + bm * H1 * 4)
        w1_traffic = nb * w1_bytes                # re-streamed per batch tile

    vmem_limit = max(8 << 20, min(int(vmem_bytes * 1.5) + (2 << 20), 48 << 20))

    cost = pl.CostEstimate(
        flops=2 * Bp * (D * H1 + H1 * H2 + H2 * OUT_PAD),
        transcendentals=Bp * OUT_PAD,
        bytes_accessed=int(x_p.size * 2 + w1_traffic
                           + (H1 * H2 + H2 * OUT_PAD) * 2
                           + (H1 + H2 + OUT_PAD) * 4
                           + Bp * OUT_PAD * 4),
    )

    out_padded = pl.pallas_call(
        kernel,
        out_shape=jax.ShapeDtypeStruct((Bp, OUT_PAD), jnp.float32),
        grid=grid,
        in_specs=[
            x_spec,                                  # x tile
            w1_spec,                                 # W1 (resident or streamed)
            pl.BlockSpec((1, H1), const),            # b1
            pl.BlockSpec((H1, H2), const),           # W2 (resident)
            pl.BlockSpec((1, H2), const),            # b2
            pl.BlockSpec((H2, OUT_PAD), const),      # W3 padded (resident)
            pl.BlockSpec((1, OUT_PAD), const),       # b3 padded
        ],
        out_specs=out_spec,
        scratch_shapes=scratch,
        compiler_params=pltpu.CompilerParams(
            dimension_semantics=semantics,
            vmem_limit_bytes=vmem_limit),
        cost_estimate=cost,
    )(x_p, prepared["w1"], prepared["b1"], prepared["w2"], prepared["b2"],
      prepared["w3"], prepared["b3"])

    # Contract: padded batch rows / lanes are sliced off here.
    return out_padded[:B, :1]


discriminator_forward = jax.jit(_discriminator_forward,
                                static_argnames=("force_stream",))


# --------------------------------------------------------------------------
# Parameter init (mimics PyTorch nn.Linear default U(-1/sqrt(fan_in), +))
# --------------------------------------------------------------------------
def init_params(image_shape, key):
    d_in = int(np.prod(image_shape))
    dims = [(d_in, H1), (H1, H2), (H2, 1)]
    params = {}
    keys = jax.random.split(key, 2 * len(dims))
    for i, (fan_in, fan_out) in enumerate(dims):
        bound = 1.0 / np.sqrt(fan_in)
        params[f"w{i+1}"] = jax.random.uniform(
            keys[2 * i], (fan_in, fan_out), jnp.float32, -bound, bound)
        params[f"b{i+1}"] = jax.random.uniform(
            keys[2 * i + 1], (1, fan_out), jnp.float32, -bound, bound)
    return params


if __name__ == "__main__":
    key = jax.random.PRNGKey(0)
    k_img, k_par = jax.random.split(key)

    # Small shapes consistent with the module: image_shape=(4,16,16), batch=2.
    image_shape = (4, 16, 16)            # C, H, W  -> flattened dim 1024
    batch = 2
    image = jax.random.normal(k_img, (batch,) + image_shape, jnp.float32)

    params = init_params(image_shape, k_par)
    prepared = prepare_params(params)    # one-time bf16 cast / pad

    # Pure-JAX f32 reference (kernel uses bf16 operands, hence tolerance).
    xr = image.reshape(batch, -1)
    pre1 = xr @ params["w1"] + params["b1"]
    h = jnp.where(pre1 >= 0, pre1, 0.2 * pre1)
    pre2 = h @ params["w2"] + params["b2"]
    h = jnp.where(pre2 >= 0, pre2, 0.2 * pre2)
    ref = jax.nn.sigmoid(h @ params["w3"] + params["b3"])

    # Default (resident-W1) path.
    validity = jax.block_until_ready(discriminator_forward(image, prepared))
    # K-streamed path (exercised explicitly so both code paths are validated).
    validity_stream = jax.block_until_ready(
        discriminator_forward(image, prepared, force_stream=True))

    assert validity.shape == (batch, 1)
    assert validity_stream.shape == (batch, 1)
    np.testing.assert_allclose(np.asarray(validity), np.asarray(ref),
                               rtol=2e-2, atol=2e-2)
    np.testing.assert_allclose(np.asarray(validity_stream), np.asarray(ref),
                               rtol=2e-2, atol=2e-2)

    print("KERNEL_OK")
</pallas_src>

<mosaic_0001>
module attributes {stable_mosaic.version = 11 : i64} {
  func.func @_disc_kernel_resident(%arg0: i32, %arg1: memref<16x1024xbf16, #tpu.memory_space<vmem>>, %arg2: memref<1024x512xbf16, #tpu.memory_space<vmem>>, %arg3: memref<1x512xf32, #tpu.memory_space<vmem>>, %arg4: memref<512x256xbf16, #tpu.memory_space<vmem>>, %arg5: memref<1x256xf32, #tpu.memory_space<vmem>>, %arg6: memref<256x128xbf16, #tpu.memory_space<vmem>>, %arg7: memref<1x128xf32, #tpu.memory_space<vmem>>, %arg8: memref<16x128xf32, #tpu.memory_space<vmem>>) attributes {dimension_semantics = [#tpu.dimension_semantics<parallel>], iteration_bounds = array<i64: 1>, scalar_prefetch = 0 : i64, scratch_operands = 0 : i64, tpu.core_type = #tpu.core_type<tc>, window_params = [{transform_indices = @transform_0, window_bounds = array<i64: 16, 1024>}, {pipeline_mode = #tpu.pipeline_mode<synchronous>, transform_indices = @transform_1, window_bounds = array<i64: 1024, 512>}, {pipeline_mode = #tpu.pipeline_mode<synchronous>, transform_indices = @transform_2, window_bounds = array<i64: 1, 512>}, {pipeline_mode = #tpu.pipeline_mode<synchronous>, transform_indices = @transform_3, window_bounds = array<i64: 512, 256>}, {pipeline_mode = #tpu.pipeline_mode<synchronous>, transform_indices = @transform_4, window_bounds = array<i64: 1, 256>}, {pipeline_mode = #tpu.pipeline_mode<synchronous>, transform_indices = @transform_5, window_bounds = array<i64: 256, 128>}, {pipeline_mode = #tpu.pipeline_mode<synchronous>, transform_indices = @transform_6, window_bounds = array<i64: 1, 128>}, {transform_indices = @transform_7, window_bounds = array<i64: 16, 128>}]} {
    %c0 = arith.constant 0 : index
    %c0_0 = arith.constant 0 : index
    %0 = vector.load %arg1[%c0, %c0_0] : memref<16x1024xbf16, #tpu.memory_space<vmem>>, vector<16x1024xbf16>
    %c0_1 = arith.constant 0 : index
    %c0_2 = arith.constant 0 : index
    %1 = vector.load %arg2[%c0_1, %c0_2] : memref<1024x512xbf16, #tpu.memory_space<vmem>>, vector<1024x512xbf16>
    %cst = arith.constant dense<0.000000e+00> : vector<16x512xf32>
    %2 = tpu.matmul %0, %1, %cst {dimension_numbers = #tpu.dot_dimension_numbers<[1], [0], [0], [1], [0, 0, 1, 1], [], []>} : vector<16x1024xbf16>, vector<1024x512xbf16>, vector<16x512xf32> -> vector<16x512xf32>
    %c0_3 = arith.constant 0 : index
    %c0_4 = arith.constant 0 : index
    %3 = vector.load %arg3[%c0_3, %c0_4] : memref<1x512xf32, #tpu.memory_space<vmem>>, vector<1x512xf32>
    %4 = vector.broadcast %3 : vector<1x512xf32> to vector<16x512xf32>
    %5 = arith.addf %2, %4 : vector<16x512xf32>
    %cst_5 = arith.constant 0.000000e+00 : f32
    %6 = vector.broadcast %cst_5 : f32 to vector<16x512xf32>
    %7 = arith.cmpf oge, %5, %6 : vector<16x512xf32>
    %cst_6 = arith.constant 2.000000e-01 : f32
    %8 = vector.broadcast %cst_6 : f32 to vector<16x512xf32>
    %9 = arith.mulf %8, %5 : vector<16x512xf32>
    %10 = arith.select %7, %5, %9 : vector<16x512xi1>, vector<16x512xf32>
    %11 = arith.truncf %10 : vector<16x512xf32> to vector<16x512xbf16>
    %c0_7 = arith.constant 0 : index
    %c0_8 = arith.constant 0 : index
    %12 = vector.load %arg4[%c0_7, %c0_8] : memref<512x256xbf16, #tpu.memory_space<vmem>>, vector<512x256xbf16>
    %cst_9 = arith.constant dense<0.000000e+00> : vector<16x256xf32>
    %13 = tpu.matmul %11, %12, %cst_9 {dimension_numbers = #tpu.dot_dimension_numbers<[1], [0], [0], [1], [0, 0, 1, 1], [], []>} : vector<16x512xbf16>, vector<512x256xbf16>, vector<16x256xf32> -> vector<16x256xf32>
    %c0_10 = arith.constant 0 : index
    %c0_11 = arith.constant 0 : index
    %14 = vector.load %arg5[%c0_10, %c0_11] : memref<1x256xf32, #tpu.memory_space<vmem>>, vector<1x256xf32>
    %15 = vector.broadcast %14 : vector<1x256xf32> to vector<16x256xf32>
    %16 = arith.addf %13, %15 : vector<16x256xf32>
    %cst_12 = arith.constant 0.000000e+00 : f32
    %17 = vector.broadcast %cst_12 : f32 to vector<16x256xf32>
    %18 = arith.cmpf oge, %16, %17 : vector<16x256xf32>
    %cst_13 = arith.constant 2.000000e-01 : f32
    %19 = vector.broadcast %cst_13 : f32 to vector<16x256xf32>
    %20 = arith.mulf %19, %16 : vector<16x256xf32>
    %21 = arith.select %18, %16, %20 : vector<16x256xi1>, vector<16x256xf32>
    %22 = arith.truncf %21 : vector<16x256xf32> to vector<16x256xbf16>
    %c0_14 = arith.constant 0 : index
    %c0_15 = arith.constant 0 : index
    %23 = vector.load %arg6[%c0_14, %c0_15] : memref<256x128xbf16, #tpu.memory_space<vmem>>, vector<256x128xbf16>
    %cst_16 = arith.constant dense<0.000000e+00> : vector<16x128xf32>
    %24 = tpu.matmul %22, %23, %cst_16 {dimension_numbers = #tpu.dot_dimension_numbers<[1], [0], [0], [1], [0, 0, 1, 1], [], []>} : vector<16x256xbf16>, vector<256x128xbf16>, vector<16x128xf32> -> vector<16x128xf32>
    %c0_17 = arith.constant 0 : index
    %c0_18 = arith.constant 0 : index
    %25 = vector.load %arg7[%c0_17, %c0_18] : memref<1x128xf32, #tpu.memory_space<vmem>>, vector<1x128xf32>
    %26 = vector.broadcast %25 : vector<1x128xf32> to vector<16x128xf32>
    %27 = arith.addf %24, %26 : vector<16x128xf32>
    %cst_19 = arith.constant 0.000000e+00 : f32
    %28 = vector.broadcast %cst_19 : f32 to vector<16x128xf32>
    %29 = arith.subf %28, %27 : vector<16x128xf32>
    %30 = math.exp %29 : vector<16x128xf32>
    %cst_20 = arith.constant 1.000000e+00 : f32
    %31 = vector.broadcast %cst_20 : f32 to vector<16x128xf32>
    %32 = arith.addf %31, %30 : vector<16x128xf32>
    %cst_21 = arith.constant 1.000000e+00 : f32
    %33 = vector.broadcast %cst_21 : f32 to vector<16x128xf32>
    %34 = arith.divf %33, %32 : vector<16x128xf32>
    %c0_22 = arith.constant 0 : index
    %c0_23 = arith.constant 0 : index
    %35 = vector.load %arg8[%c0_22, %c0_23] : memref<16x128xf32, #tpu.memory_space<vmem>>, vector<16x128xf32>
    tpu.vector_store %arg8[%c0_22, %c0_23], %34 {strides = array<i32>} : memref<16x128xf32, #tpu.memory_space<vmem>>, vector<16x128xf32>,
    return
  }
  func.func @transform_0(%arg0: i32) -> (i32, i32) {
    %c0_i32 = arith.constant 0 : i32
    %c0_i32_0 = arith.constant 0 : i32
    return %arg0, %c0_i32 : i32, i32
  }
  func.func @transform_1(%arg0: i32) -> (i32, i32) {
    %c0_i32 = arith.constant 0 : i32
    %c0_i32_0 = arith.constant 0 : i32
    %c0_i32_1 = arith.constant 0 : i32
    return %c0_i32, %c0_i32_0 : i32, i32
  }
  func.func @transform_2(%arg0: i32) -> (i32, i32) {
    %c0_i32 = arith.constant 0 : i32
    %c0_i32_0 = arith.constant 0 : i32
    %c0_i32_1 = arith.constant 0 : i32
    return %c0_i32, %c0_i32_0 : i32, i32
  }
  func.func @transform_3(%arg0: i32) -> (i32, i32) {
    %c0_i32 = arith.constant 0 : i32
    %c0_i32_0 = arith.constant 0 : i32
    %c0_i32_1 = arith.constant 0 : i32
    return %c0_i32, %c0_i32_0 : i32, i32
  }
  func.func @transform_4(%arg0: i32) -> (i32, i32) {
    %c0_i32 = arith.constant 0 : i32
    %c0_i32_0 = arith.constant 0 : i32
    %c0_i32_1 = arith.constant 0 : i32
    return %c0_i32, %c0_i32_0 : i32, i32
  }
  func.func @transform_5(%arg0: i32) -> (i32, i32) {
    %c0_i32 = arith.constant 0 : i32
    %c0_i32_0 = arith.constant 0 : i32
    %c0_i32_1 = arith.constant 0 : i32
    return %c0_i32, %c0_i32_0 : i32, i32
  }
  func.func @transform_6(%arg0: i32) -> (i32, i32) {
    %c0_i32 = arith.constant 0 : i32
    %c0_i32_0 = arith.constant 0 : i32
    %c0_i32_1 = arith.constant 0 : i32
    return %c0_i32, %c0_i32_0 : i32, i32
  }
  func.func @transform_7(%arg0: i32) -> (i32, i32) {
    %c0_i32 = arith.constant 0 : i32
    %c0_i32_0 = arith.constant 0 : i32
    return %arg0, %c0_i32 : i32, i32
  }
}

</mosaic_0001>

<bundles_post_ra>
// kernel: _discriminator_forward.1
= control target key start
LH: loop header
LB: loop body
LE: loop exit
PB: predicated region body
PF: predicated region fallthrough
CT: control target
= control target key end

     0   :  { %12 = vsyncpa [#allocation3], 0  ;;  %s3920_s0 = inlined_call_operand.vmem [shape: bf16[16,1024], index: 0, kind: input, shape index: {}]   ;;  %s3921_s1 = inlined_call_operand.hbm [shape: bf16[1024,512], index: 1, kind: input, shape index: {}]   ;;  %s3922_s2 = inlined_call_operand.vmem [shape: f32[1,512], index: 2, kind: input, shape index: {}]   ;;  %s3923_s3 = inlined_call_operand.hbm [shape: bf16[512,256], index: 3, kind: input, shape index: {}]   ;;  %s3924_s4 = inlined_call_operand.vmem [shape: f32[1,256], index: 4, kind: input, shape index: {}]   ;;  %s3925_s5 = inlined_call_operand.vmem [shape: bf16[256,128], index: 5, kind: input, shape index: {}]   ;;  %s3926_s6 = inlined_call_operand.vmem [shape: f32[1,128], index: 6, kind: input, shape index: {}]   ;;  %s3927_s7 = inlined_call_operand.vmem [shape: f32[16,128], index: 7, kind: output, shape index: {}]  }
   0x1   :  { %13 = vsyncpa [#allocation5], 0  ;;  %s3690_s24 = smov [#allocation2]   ;;  %s3642_s28 = scalar_lea.hbm %s3921_s1, 32768 }
   0x2   :  { %s21_s25 = sshll.u32 %s3690_s24, 4  ;;  %p3643_p0 = scmp.ne.s32.totalorder %s3921_s1, %s3642_s28  ;;  %s22_s25 = int_to_ptr.vmem [resolvable:$true] %s21_s25 }
   0x3   :  { %p3646_p1 = scmp.lt.u32.totalorder %s3642_s28, %s3921_s1 }
   0x5   :  { %p3648_p2 = pnand %p3646_p1, %p3643_p0 }
   0x7   :  { %3651 = shalt.err (!%p3648_p2)
}
   0x8   :  { %s3652_s10 = scalar_lea.vmem %s22_s25, 32768  ;;  %p3657_p4 = scmp.lt.s32.totalorder %s22_s25, %s22_s25 }
   0x9   :  { %p3653_p3 = scmp.ne.s32.totalorder %s22_s25, %s3652_s10  ;;  %p3658_p5 = scmp.lt.s32.totalorder %s3652_s10, %s3652_s10 }
   0xb   :  { %p3659_p6 = por %p3658_p5, %p3657_p4 }
   0xd   :  { %p3660_p7 = pnand %p3659_p6, %p3653_p3 }
   0xf   :  { %3663 = shalt.err (!%p3660_p7)
}
  0x10   :  { %s3691_s11 = smov 256   ;;  %s3692_s12 = smov 16  }
  0x11   :  { %27 = dma.hbm_to_vmem [thread:$0]  %s3921_s1, 32768, %s22_s25, [#allocation3], %s3691_s11, %s3691_s11, %s3692_s12  }
  0x12   :  { %s3693_s15 = smov [#allocation4]   ;;  %s3664_s19 = scalar_lea.hbm %s3923_s3, 8192 }
  0x13   :  { %s35_s16 = sshll.u32 %s3693_s15, 4  ;;  %p3665_p8 = scmp.ne.s32.totalorder %s3923_s3, %s3664_s19  ;;  %s36_s16 = int_to_ptr.vmem [resolvable:$true] %s35_s16 }
  0x14   :  { %p3668_p9 = scmp.lt.u32.totalorder %s3664_s19, %s3923_s3 }
  0x16   :  { %p3670_p10 = pnand %p3668_p9, %p3665_p8 }
  0x18   :  { %3673 = shalt.err (!%p3670_p10)
}
  0x19   :  { %s3674_s24 = scalar_lea.vmem %s36_s16, 8192  ;;  %p3679_p12 = scmp.lt.s32.totalorder %s36_s16, %s36_s16 }
  0x1a   :  { %p3675_p11 = scmp.ne.s32.totalorder %s36_s16, %s3674_s24  ;;  %p3680_p13 = scmp.lt.s32.totalorder %s3674_s24, %s3674_s24 }
  0x1c   :  { %p3681_p0 = por %p3680_p13, %p3679_p12 }
  0x1e   :  { %p3682_p1 = pnand %p3681_p0, %p3675_p11 }
  0x20   :  { %3685 = shalt.err (!%p3682_p1)
}
  0x21   :  { %s3694_s1 = smov 128   ;;  %s3695_s25 = smov 8  }
  0x22   :  { %41 = dma.hbm_to_vmem [thread:$0]  %s3923_s3, 8192, %s36_s16, [#allocation5], %s3694_s1, %s3694_s1, %s3695_s25  }
  0x23   :  { %3686 = dma.done.wait [#allocation3], 32768  }
  0x24   :  { %3687 = vsyncadd [#allocation3], 4294934528 }
  0x25   :  { %3688 = dma.done.wait [#allocation5], 8192  }
  0x26   :  { %3689 = vsyncadd [#allocation5], 4294959104  ;;  %v3138_v0 = vld [vmem:[#allocation2 + $0x4] ss:$16 sps:$4 sm:$0xff]   ;;  %v3142_v2 = vld [vmem:[#allocation2] ss:$16 sps:$4 sm:$0xff]  }
  0x27   :  { %v3140_v1 = vld [vmem:[#allocation2 + $0x204] ss:$16 sps:$4 sm:$0xff]   ;;  %1661 = vmatprep.subr.bf16.mxu1 %v3138_v0  ;;  %v3143_v3 = vld [vmem:[#allocation2 + $0x200] ss:$16 sps:$4 sm:$0xff]   ;;  %v56_v50 = vld [vmem:[%s3920_s0 + $0x8] sm:$0xff] }
  0x28   :  { %1704 = vmatprep.subr.bf16.mxu0 %v3140_v1  ;;  %v3144_v4 = vld [vmem:[#allocation2 + $0x24] ss:$16 sps:$4 sm:$0xff]   ;;  %1662 = vmatpush1.bf16.msra.mxu1 %v3142_v2  ;;  %v3148_v6 = vld [vmem:[#allocation2 + $0x20] ss:$16 sps:$4 sm:$0xff]   ;;  %v60_v51 = vld [vmem:[%s3920_s0 + $0x28] sm:$0xff] }
  0x29   :  { %1705 = vmatpush1.bf16.msra.mxu0 %v3143_v3  ;;  %v3146_v5 = vld [vmem:[#allocation2 + $0x224] ss:$16 sps:$4 sm:$0xff]   ;;  %1663 = vmatprep.subr.bf16.mxu1 %v3144_v4  ;;  %v3149_v7 = vld [vmem:[#allocation2 + $0x220] ss:$16 sps:$4 sm:$0xff]   ;;  %v3772_v55 = vcombine.high %v56_v50, %v60_v51 }
  0x2a   :  { %1706 = vmatprep.subr.bf16.mxu0 %v3146_v5  ;;  %v3150_v8 = vld [vmem:[#allocation2 + $0x44] ss:$16 sps:$4 sm:$0xff]   ;;  %v3154_v10 = vld [vmem:[#allocation2 + $0x40] ss:$16 sps:$4 sm:$0xff]  }
  0x2b   :  { %v3152_v9 = vld [vmem:[#allocation2 + $0x244] ss:$16 sps:$4 sm:$0xff]   ;;  %v3155_v11 = vld [vmem:[#allocation2 + $0x240] ss:$16 sps:$4 sm:$0xff]   ;;  %1736 = vmatprep.mubr.bf16.mxu0 %v3772_v55 }
  0x2c   :  { %1664 = vmatpush1.bf16.msra.mxu1 %v3148_v6  ;;  %v3156_v12 = vld [vmem:[#allocation2 + $0x64] ss:$16 sps:$4 sm:$0xff]   ;;  %v3160_v14 = vld [vmem:[#allocation2 + $0x60] ss:$16 sps:$4 sm:$0xff]  }
  0x2d   :  { %1707 = vmatpush1.bf16.msra.mxu0 %v3149_v7  ;;  %1665 = vmatprep.subr.bf16.mxu1 %v3150_v8  ;;  %v3158_v13 = vld [vmem:[#allocation2 + $0x264] ss:$16 sps:$4 sm:$0xff]   ;;  %v3161_v15 = vld [vmem:[#allocation2 + $0x260] ss:$16 sps:$4 sm:$0xff]   ;;  %v3239_v7 = vld [vmem:[#allocation2 + $0xc] ss:$16 sps:$4 sm:$0xff]  }
  0x2e   :  { %1708 = vmatprep.subr.bf16.mxu0 %v3152_v9  ;;  %v3162_v16 = vld [vmem:[#allocation2 + $0x84] ss:$16 sps:$4 sm:$0xff]   ;;  %v3166_v18 = vld [vmem:[#allocation2 + $0x80] ss:$16 sps:$4 sm:$0xff]   ;;  %v3777_v9 = vcombine.low %v56_v50, %v60_v51  ;;  %v3291_v50 = vld [vmem:[#allocation2 + $0x128] ss:$16 sps:$4 sm:$0xff]  }
  0x2f   :  { %v3164_v17 = vld [vmem:[#allocation2 + $0x284] ss:$16 sps:$4 sm:$0xff]   ;;  %v3167_v19 = vld [vmem:[#allocation2 + $0x280] ss:$16 sps:$4 sm:$0xff]  }
  0x30   :  { %1666 = vmatpush1.bf16.msra.mxu1 %v3154_v10  ;;  %v3168_v20 = vld [vmem:[#allocation2 + $0xa4] ss:$16 sps:$4 sm:$0xff]   ;;  %v3172_v22 = vld [vmem:[#allocation2 + $0xa0] ss:$16 sps:$4 sm:$0xff]  }
  0x31   :  { %1709 = vmatpush1.bf16.msra.mxu0 %v3155_v11  ;;  %1667 = vmatprep.subr.bf16.mxu1 %v3156_v12  ;;  %v3170_v21 = vld [vmem:[#allocation2 + $0x2a4] ss:$16 sps:$4 sm:$0xff]   ;;  %v3173_v23 = vld [vmem:[#allocation2 + $0x2a0] ss:$16 sps:$4 sm:$0xff]   ;;  %v3237_v11 = vld [vmem:[#allocation2 + $0x8] ss:$16 sps:$4 sm:$0xff]  }
  0x32   :  { %1710 = vmatprep.subr.bf16.mxu0 %v3158_v13  ;;  %v3174_v24 = vld [vmem:[#allocation2 + $0xc4] ss:$16 sps:$4 sm:$0xff]   ;;  %v3178_v26 = vld [vmem:[#allocation2 + $0xc0] ss:$16 sps:$4 sm:$0xff]   ;;  %v3245_v13 = vld [vmem:[#allocation2 + $0x2c] ss:$16 sps:$4 sm:$0xff]  }
  0x33   :  { %v3176_v25 = vld [vmem:[#allocation2 + $0x2c4] ss:$16 sps:$4 sm:$0xff]   ;;  %v3179_v27 = vld [vmem:[#allocation2 + $0x2c0] ss:$16 sps:$4 sm:$0xff]  }
  0x34   :  { %1668 = vmatpush1.bf16.msra.mxu1 %v3160_v14  ;;  %v3180_v28 = vld [vmem:[#allocation2 + $0xe4] ss:$16 sps:$4 sm:$0xff]   ;;  %v3184_v30 = vld [vmem:[#allocation2 + $0xe0] ss:$16 sps:$4 sm:$0xff]  }
  0x35   :  { %1711 = vmatpush1.bf16.msra.mxu0 %v3161_v15  ;;  %1669 = vmatprep.subr.bf16.mxu1 %v3162_v16  ;;  %v3182_v29 = vld [vmem:[#allocation2 + $0x2e4] ss:$16 sps:$4 sm:$0xff]   ;;  %v3185_v31 = vld [vmem:[#allocation2 + $0x2e0] ss:$16 sps:$4 sm:$0xff]   ;;  %v3243_v15 = vld [vmem:[#allocation2 + $0x28] ss:$16 sps:$4 sm:$0xff]  }
  0x36   :  { %1712 = vmatprep.subr.bf16.mxu0 %v3164_v17  ;;  %v3186_v32 = vld [vmem:[#allocation2 + $0x104] ss:$16 sps:$4 sm:$0xff]   ;;  %v3190_v34 = vld [vmem:[#allocation2 + $0x100] ss:$16 sps:$4 sm:$0xff]   ;;  %v3251_v17 = vld [vmem:[#allocation2 + $0x4c] ss:$16 sps:$4 sm:$0xff]  }
  0x37   :  { %v3188_v33 = vld [vmem:[#allocation2 + $0x304] ss:$16 sps:$4 sm:$0xff]   ;;  %v3191_v35 = vld [vmem:[#allocation2 + $0x300] ss:$16 sps:$4 sm:$0xff]  }
  0x38   :  { %1670 = vmatpush1.bf16.msra.mxu1 %v3166_v18  ;;  %v3192_v36 = vld [vmem:[#allocation2 + $0x124] ss:$16 sps:$4 sm:$0xff]   ;;  %v3196_v38 = vld [vmem:[#allocation2 + $0x120] ss:$16 sps:$4 sm:$0xff]  }
  0x39   :  { %1713 = vmatpush1.bf16.msra.mxu0 %v3167_v19  ;;  %1671 = vmatprep.subr.bf16.mxu1 %v3168_v20  ;;  %v3194_v37 = vld [vmem:[#allocation2 + $0x324] ss:$16 sps:$4 sm:$0xff]   ;;  %v3197_v39 = vld [vmem:[#allocation2 + $0x320] ss:$16 sps:$4 sm:$0xff]   ;;  %v3249_v19 = vld [vmem:[#allocation2 + $0x48] ss:$16 sps:$4 sm:$0xff]  }
  0x3a   :  { %1714 = vmatprep.subr.bf16.mxu0 %v3170_v21  ;;  %v3198_v40 = vld [vmem:[#allocation2 + $0x144] ss:$16 sps:$4 sm:$0xff]   ;;  %v3202_v42 = vld [vmem:[#allocation2 + $0x140] ss:$16 sps:$4 sm:$0xff]   ;;  %v3257_v21 = vld [vmem:[#allocation2 + $0x6c] ss:$16 sps:$4 sm:$0xff]  }
  0x3b   :  { %v3200_v41 = vld [vmem:[#allocation2 + $0x344] ss:$16 sps:$4 sm:$0xff]   ;;  %v3203_v43 = vld [vmem:[#allocation2 + $0x340] ss:$16 sps:$4 sm:$0xff]  }
  0x3c   :  { %1672 = vmatpush1.bf16.msra.mxu1 %v3172_v22  ;;  %v3204_v44 = vld [vmem:[#allocation2 + $0x164] ss:$16 sps:$4 sm:$0xff]   ;;  %v3208_v46 = vld [vmem:[#allocation2 + $0x160] ss:$16 sps:$4 sm:$0xff]  }
  0x3d   :  { %1715 = vmatpush1.bf16.msra.mxu0 %v3173_v23  ;;  %1673 = vmatprep.subr.bf16.mxu1 %v3174_v24  ;;  %v3206_v45 = vld [vmem:[#allocation2 + $0x364] ss:$16 sps:$4 sm:$0xff]   ;;  %v3209_v47 = vld [vmem:[#allocation2 + $0x360] ss:$16 sps:$4 sm:$0xff]   ;;  %v3255_v23 = vld [vmem:[#allocation2 + $0x68] ss:$16 sps:$4 sm:$0xff]  }
  0x3e   :  { %1716 = vmatprep.subr.bf16.mxu0 %v3176_v25  ;;  %v55_v48 = vld [vmem:[%s3920_s0] sm:$0xff]  ;;  %v3263_v25 = vld [vmem:[#allocation2 + $0x8c] ss:$16 sps:$4 sm:$0xff]  }
  0x3f   :  { %v59_v49 = vld [vmem:[%s3920_s0 + $0x20] sm:$0xff] }
  0x40   :  { %1674 = vmatpush1.bf16.msra.mxu1 %v3178_v26  ;;  %v3210_v52 = vld [vmem:[#allocation2 + $0x184] ss:$16 sps:$4 sm:$0xff]   ;;  %v2726_v53 = vcombine.high %v55_v48, %v59_v49  ;;  %v3214_v56 = vld [vmem:[#allocation2 + $0x180] ss:$16 sps:$4 sm:$0xff]   ;;  %v3775_v8 = vcombine.low %v55_v48, %v59_v49  ;;  %v3293_v48 = vld [vmem:[#allocation2 + $0x12c] ss:$16 sps:$4 sm:$0xff]  }
  0x41   :  { %1717 = vmatpush1.bf16.msra.mxu0 %v3179_v27  ;;  %1675 = vmatprep.subr.bf16.mxu1 %v3180_v28  ;;  %v3212_v54 = vld [vmem:[#allocation2 + $0x384] ss:$16 sps:$4 sm:$0xff]   ;;  %v3215_v57 = vld [vmem:[#allocation2 + $0x380] ss:$16 sps:$4 sm:$0xff]   ;;  %v3261_v27 = vld [vmem:[#allocation2 + $0x88] ss:$16 sps:$4 sm:$0xff]  }
  0x42   :  { %1718 = vmatprep.subr.bf16.mxu0 %v3182_v29  ;;  %1693 = vmatprep.mubr.bf16.mxu1 %v2726_v53  ;;  %v3216_v58 = vld [vmem:[#allocation2 + $0x1a4] ss:$16 sps:$4 sm:$0xff]   ;;  %v3220_v60 = vld [vmem:[#allocation2 + $0x1a0] ss:$16 sps:$4 sm:$0xff]   ;;  %v3269_v29 = vld [vmem:[#allocation2 + $0xac] ss:$16 sps:$4 sm:$0xff]  }
  0x43   :  { %v3218_v59 = vld [vmem:[#allocation2 + $0x3a4] ss:$16 sps:$4 sm:$0xff]   ;;  %v3221_v61 = vld [vmem:[#allocation2 + $0x3a0] ss:$16 sps:$4 sm:$0xff]  }
  0x44   :  { %1676 = vmatpush1.bf16.msra.mxu1 %v3184_v30  ;;  %v3222_v62 = vld [vmem:[#allocation2 + $0x1c4] ss:$16 sps:$4 sm:$0xff]   ;;  %v3226_v0 = vld [vmem:[#allocation2 + $0x1c0] ss:$16 sps:$4 sm:$0xff]  }
  0x45   :  { %1719 = vmatpush1.bf16.msra.mxu0 %v3185_v31  ;;  %1677 = vmatprep.subr.bf16.mxu1 %v3186_v32  ;;  %v3224_v63 = vld [vmem:[#allocation2 + $0x3c4] ss:$16 sps:$4 sm:$0xff]   ;;  %v3227_v1 = vld [vmem:[#allocation2 + $0x3c0] ss:$16 sps:$4 sm:$0xff]   ;;  %v3267_v31 = vld [vmem:[#allocation2 + $0xa8] ss:$16 sps:$4 sm:$0xff]  }
  0x46   :  { %1720 = vmatprep.subr.bf16.mxu0 %v3188_v33  ;;  %v3228_v2 = vld [vmem:[#allocation2 + $0x1e4] ss:$16 sps:$4 sm:$0xff]   ;;  %v3232_v4 = vld [vmem:[#allocation2 + $0x1e0] ss:$16 sps:$4 sm:$0xff]   ;;  %v3275_v33 = vld [vmem:[#allocation2 + $0xcc] ss:$16 sps:$4 sm:$0xff]  }
  0x47   :  { %v3230_v3 = vld [vmem:[#allocation2 + $0x3e4] ss:$16 sps:$4 sm:$0xff]   ;;  %v3233_v5 = vld [vmem:[#allocation2 + $0x3e0] ss:$16 sps:$4 sm:$0xff]  }
  0x48   :  { %1678 = vmatpush1.bf16.msra.mxu1 %v3190_v34  ;;  %v3236_v6 = vld [vmem:[#allocation2 + $0x404] ss:$16 sps:$4 sm:$0xff]   ;;  %v3234_v10 = vld [vmem:[#allocation2 + $0x400] ss:$16 sps:$4 sm:$0xff]  }
  0x49   :  { %1721 = vmatpush1.bf16.msra.mxu0 %v3191_v35  ;;  %1679 = vmatprep.subr.bf16.mxu1 %v3192_v36  ;;  %v3242_v12 = vld [vmem:[#allocation2 + $0x424] ss:$16 sps:$4 sm:$0xff]   ;;  %v3240_v14 = vld [vmem:[#allocation2 + $0x420] ss:$16 sps:$4 sm:$0xff]  }
  0x4a   :  { %1722 = vmatprep.subr.bf16.mxu0 %v3194_v37  ;;  %v3248_v16 = vld [vmem:[#allocation2 + $0x444] ss:$16 sps:$4 sm:$0xff]   ;;  %v3246_v18 = vld [vmem:[#allocation2 + $0x440] ss:$16 sps:$4 sm:$0xff]   ;;  %v3273_v37 = vld [vmem:[#allocation2 + $0xc8] ss:$16 sps:$4 sm:$0xff]  }
  0x4b   :  { %v3254_v20 = vld [vmem:[#allocation2 + $0x464] ss:$16 sps:$4 sm:$0xff]   ;;  %v3252_v22 = vld [vmem:[#allocation2 + $0x460] ss:$16 sps:$4 sm:$0xff]  }
  0x4c   :  { %1680 = vmatpush1.bf16.msra.mxu1 %v3196_v38  ;;  %v3260_v24 = vld [vmem:[#allocation2 + $0x484] ss:$16 sps:$4 sm:$0xff]   ;;  %v3258_v26 = vld [vmem:[#allocation2 + $0x480] ss:$16 sps:$4 sm:$0xff]  }
  0x4d   :  { %1723 = vmatpush1.bf16.msra.mxu0 %v3197_v39  ;;  %1681 = vmatprep.subr.bf16.mxu1 %v3198_v40  ;;  %v3266_v28 = vld [vmem:[#allocation2 + $0x4a4] ss:$16 sps:$4 sm:$0xff]   ;;  %v3264_v30 = vld [vmem:[#allocation2 + $0x4a0] ss:$16 sps:$4 sm:$0xff]   ;;  %v3281_v40 = vld [vmem:[#allocation2 + $0xec] ss:$16 sps:$4 sm:$0xff]  }
  0x4e   :  { %1724 = vmatprep.subr.bf16.mxu0 %v3200_v41  ;;  %v3272_v32 = vld [vmem:[#allocation2 + $0x4c4] ss:$16 sps:$4 sm:$0xff]   ;;  %v3270_v36 = vld [vmem:[#allocation2 + $0x4c0] ss:$16 sps:$4 sm:$0xff]  }
  0x4f   :  { %v3784_v34 = vld [vmem:[%s3920_s0 + $0x10] sm:$0xff] }
  0x50   :  { %1682 = vmatpush1.bf16.msra.mxu1 %v3202_v42  ;;  %v3789_v35 = vld [vmem:[%s3920_s0 + $0x30] sm:$0xff]  ;;  %v3279_v42 = vld [vmem:[#allocation2 + $0xe8] ss:$16 sps:$4 sm:$0xff]  }
  0x51   :  { %1725 = vmatpush1.bf16.msra.mxu0 %v3203_v43  ;;  %1683 = vmatprep.subr.bf16.mxu1 %v3204_v44  ;;  %v3793_v38 = vcombine.high %v3784_v34, %v3789_v35  ;;  %v3278_v39 = vld [vmem:[#allocation2 + $0x4e4] ss:$16 sps:$4 sm:$0xff]   ;;  %v3276_v41 = vld [vmem:[#allocation2 + $0x4e0] ss:$16 sps:$4 sm:$0xff]   ;;  %v3287_v44 = vld [vmem:[#allocation2 + $0x10c] ss:$16 sps:$4 sm:$0xff]  }
  0x52   :  { %1726 = vmatprep.subr.bf16.mxu0 %v3206_v45  ;;  %v3284_v43 = vld [vmem:[#allocation2 + $0x504] ss:$16 sps:$4 sm:$0xff]   ;;  %v3282_v45 = vld [vmem:[#allocation2 + $0x500] ss:$16 sps:$4 sm:$0xff]  }
  0x53   :  { %v3288_v49 = vld [vmem:[#allocation2 + $0x520] ss:$16 sps:$4 sm:$0xff]   ;;  %v3296_v51 = vld [vmem:[#allocation2 + $0x544] ss:$16 sps:$4 sm:$0xff]  }
  0x54   :  { %1684 = vmatpush1.bf16.msra.mxu1 %v3208_v46  ;;  %v3285_v46 = vld [vmem:[#allocation2 + $0x108] ss:$16 sps:$4 sm:$0xff]  }
  0x55   :  { %1727 = vmatpush1.bf16.msra.mxu0 %v3209_v47  ;;  %1685 = vmatprep.subr.bf16.mxu1 %v3210_v52  ;;  %v3290_v47 = vld [vmem:[#allocation2 + $0x524] ss:$16 sps:$4 sm:$0xff]   ;;  %v3299_v52 = vld [vmem:[#allocation2 + $0x14c] ss:$16 sps:$4 sm:$0xff]  }
  0x56   :  { %1728 = vmatprep.subr.bf16.mxu0 %v3212_v54  ;;  %v3297_v54 = vld [vmem:[#allocation2 + $0x148] ss:$16 sps:$4 sm:$0xff]  }
  0x58   :  { %1686 = vmatpush1.bf16.msra.mxu1 %v3214_v56  ;;  %v3302_v56 = vld [vmem:[#allocation2 + $0x564] ss:$16 sps:$4 sm:$0xff]  }
  0x59   :  { %1729 = vmatpush1.bf16.msra.mxu0 %v3215_v57  ;;  %1687 = vmatprep.subr.bf16.mxu1 %v3216_v58  ;;  %v3305_v57 = vld [vmem:[#allocation2 + $0x16c] ss:$16 sps:$4 sm:$0xff]   ;;  %v3300_v58 = vld [vmem:[#allocation2 + $0x560] ss:$16 sps:$4 sm:$0xff]  }
  0x5a   :  { %1730 = vmatprep.subr.bf16.mxu0 %v3218_v59  ;;  %v3303_v59 = vld [vmem:[#allocation2 + $0x168] ss:$16 sps:$4 sm:$0xff]  }
  0x5c   :  { %1688 = vmatpush1.bf16.msra.mxu1 %v3220_v60  ;;  %v3308_v60 = vld [vmem:[#allocation2 + $0x584] ss:$16 sps:$4 sm:$0xff]  }
  0x5d   :  { %1731 = vmatpush1.bf16.msra.mxu0 %v3221_v61  ;;  %1689 = vmatprep.subr.bf16.mxu1 %v3222_v62  ;;  %v3311_v61 = vld [vmem:[#allocation2 + $0x18c] ss:$16 sps:$4 sm:$0xff]   ;;  %v3306_v62 = vld [vmem:[#allocation2 + $0x580] ss:$16 sps:$4 sm:$0xff]  }
  0x5e   :  { %1732 = vmatprep.subr.bf16.mxu0 %v3224_v63  ;;  %v3309_v63 = vld [vmem:[#allocation2 + $0x188] ss:$16 sps:$4 sm:$0xff]  }
  0x60   :  { %1690 = vmatpush1.bf16.msra.mxu1 %v3226_v0  ;;  %v3314_v0 = vld [vmem:[#allocation2 + $0x5a4] ss:$16 sps:$4 sm:$0xff]  }
  0x61   :  { %1733 = vmatpush1.bf16.msra.mxu0 %v3227_v1  ;;  %1691 = vmatprep.subr.bf16.mxu1 %v3228_v2  ;;  %v3317_v1 = vld [vmem:[#allocation2 + $0x1ac] ss:$16 sps:$4 sm:$0xff]   ;;  %v3312_v2 = vld [vmem:[#allocation2 + $0x5a0] ss:$16 sps:$4 sm:$0xff]  }
  0x62   :  { %1734 = vmatprep.subr.bf16.mxu0 %v3230_v3  ;;  %v3315_v3 = vld [vmem:[#allocation2 + $0x1a8] ss:$16 sps:$4 sm:$0xff]  }
  0x64   :  { %1692 = vmatpush1.bf16.msra.mxu1 %v3232_v4  ;;  %v3320_v4 = vld [vmem:[#allocation2 + $0x5c4] ss:$16 sps:$4 sm:$0xff]  }
  0x65   :  { %1735 = vmatpush1.bf16.msra.mxu0 %v3233_v5  ;;  %1833 = vmatprep.subr.bf16.mxu1 %v3239_v7  ;;  %v3323_v5 = vld [vmem:[#allocation2 + $0x1cc] ss:$16 sps:$4 sm:$0xff]   ;;  %v3321_v7 = vld [vmem:[#allocation2 + $0x1c8] ss:$16 sps:$4 sm:$0xff]  }
  0x66   :  { %1747 = vmatprep.subr.bf16.mxu0 %v3236_v6  ;;  %v3318_v6 = vld [vmem:[#allocation2 + $0x5c0] ss:$16 sps:$4 sm:$0xff]  }
  0x67   :  { %1694 = vmatmul.mubr.bf16.vlgmr.msra.gmra.mrb[0].mxu1 %v3775_v8 }
  0x68   :  { %1737 = vmatmul.mubr.bf16.vlgmr.msra.gmra.mrb[0].mxu0 %v3777_v9  ;;  %1834 = vmatpush1.bf16.msra.mxu1 %v3237_v11  ;;  %v3329_v11 = vld [vmem:[#allocation2 + $0x1ec] ss:$16 sps:$4 sm:$0xff]  }
  0x69   :  { %1748 = vmatpush1.bf16.msra.mxu0 %v3234_v10  ;;  %1835 = vmatprep.subr.bf16.mxu1 %v3245_v13  ;;  %v3326_v10 = vld [vmem:[#allocation2 + $0x5e4] ss:$16 sps:$4 sm:$0xff]   ;;  %v3327_v13 = vld [vmem:[#allocation2 + $0x1e8] ss:$16 sps:$4 sm:$0xff]  }
  0x6a   :  { %1749 = vmatprep.subr.bf16.mxu0 %v3242_v12  ;;  %1865 = vmatprep.mubr.bf16.mxu1 %v2726_v53  ;;  %v3294_v53 = vld [vmem:[#allocation2 + $0x540] ss:$16 sps:$4 sm:$0xff]  }
  0x6b   :  { %1779 = vmatprep.mubr.bf16.mxu0 %v3793_v38  ;;  %v3324_v12 = vld [vmem:[#allocation2 + $0x5e0] ss:$16 sps:$4 sm:$0xff]  }
  0x6c   :  { %1836 = vmatpush1.bf16.msra.mxu1 %v3243_v15  ;;  %v3335_v15 = vld [vmem:[#allocation2 + $0x20c] ss:$16 sps:$4 sm:$0xff]  }
  0x6d   :  { %1750 = vmatpush1.bf16.msra.mxu0 %v3240_v14  ;;  %1837 = vmatprep.subr.bf16.mxu1 %v3251_v17  ;;  %v3332_v14 = vld [vmem:[#allocation2 + $0x604] ss:$16 sps:$4 sm:$0xff]   ;;  %v3330_v17 = vld [vmem:[#allocation2 + $0x600] ss:$16 sps:$4 sm:$0xff]  }
  0x6e   :  { %1751 = vmatprep.subr.bf16.mxu0 %v3248_v16  ;;  %v3798_v16 = vcombine.low %v3784_v34, %v3789_v35  ;;  %v3359_v34 = vld [vmem:[#allocation2 + $0x28c] ss:$16 sps:$4 sm:$0xff]   ;;  %v3354_v35 = vld [vmem:[#allocation2 + $0x680] ss:$16 sps:$4 sm:$0xff]  }
  0x70   :  { %1838 = vmatpush1.bf16.msra.mxu1 %v3249_v19  ;;  %v3338_v19 = vld [vmem:[#allocation2 + $0x624] ss:$16 sps:$4 sm:$0xff]  }
  0x71   :  { %1752 = vmatpush1.bf16.msra.mxu0 %v3246_v18  ;;  %1839 = vmatprep.subr.bf16.mxu1 %v3257_v21  ;;  %v3333_v18 = vld [vmem:[#allocation2 + $0x208] ss:$16 sps:$4 sm:$0xff]  }
  0x72   :  { %1753 = vmatprep.subr.bf16.mxu0 %v3254_v20  ;;  %v3341_v20 = vld [vmem:[#allocation2 + $0x22c] ss:$16 sps:$4 sm:$0xff]  }
  0x73   :  { %v3803_v21 = vld [vmem:[%s3920_s0 + $0x18] sm:$0xff] }
  0x74   :  { %1840 = vmatpush1.bf16.msra.mxu1 %v3255_v23  ;;  %v3336_v23 = vld [vmem:[#allocation2 + $0x620] ss:$16 sps:$4 sm:$0xff]  }
  0x75   :  { %1754 = vmatpush1.bf16.msra.mxu0 %v3252_v22  ;;  %1841 = vmatprep.subr.bf16.mxu1 %v3263_v25  ;;  %v3808_v22 = vld [vmem:[%s3920_s0 + $0x38] sm:$0xff] }
  0x76   :  { %1755 = vmatprep.subr.bf16.mxu0 %v3260_v24  ;;  %v3339_v24 = vld [vmem:[#allocation2 + $0x228] ss:$16 sps:$4 sm:$0xff]   ;;  %v3814_v25 = vcombine.high %v3803_v21, %v3808_v22 }
  0x78   :  { %1842 = vmatpush1.bf16.msra.mxu1 %v3261_v27  ;;  %v3347_v27 = vld [vmem:[#allocation2 + $0x24c] ss:$16 sps:$4 sm:$0xff]  }
  0x79   :  { %1756 = vmatpush1.bf16.msra.mxu0 %v3258_v26  ;;  %1843 = vmatprep.subr.bf16.mxu1 %v3269_v29  ;;  %v3344_v26 = vld [vmem:[#allocation2 + $0x644] ss:$16 sps:$4 sm:$0xff]   ;;  %v3345_v29 = vld [vmem:[#allocation2 + $0x248] ss:$16 sps:$4 sm:$0xff]  }
  0x7a   :  { %1757 = vmatprep.subr.bf16.mxu0 %v3266_v28  ;;  %v3342_v28 = vld [vmem:[#allocation2 + $0x640] ss:$16 sps:$4 sm:$0xff]  }
  0x7c   :  { %1844 = vmatpush1.bf16.msra.mxu1 %v3267_v31  ;;  %v3348_v31 = vld [vmem:[#allocation2 + $0x660] ss:$16 sps:$4 sm:$0xff]  }
  0x7d   :  { %1758 = vmatpush1.bf16.msra.mxu0 %v3264_v30  ;;  %1845 = vmatprep.subr.bf16.mxu1 %v3275_v33  ;;  %v3353_v30 = vld [vmem:[#allocation2 + $0x26c] ss:$16 sps:$4 sm:$0xff]   ;;  %v3356_v33 = vld [vmem:[#allocation2 + $0x684] ss:$16 sps:$4 sm:$0xff]  }
  0x7e   :  { %1759 = vmatprep.subr.bf16.mxu0 %v3272_v32  ;;  %v3351_v32 = vld [vmem:[#allocation2 + $0x268] ss:$16 sps:$4 sm:$0xff]  }
  0x80   :  { %1846 = vmatpush1.bf16.msra.mxu1 %v3273_v37  ;;  %v3365_v37 = vld [vmem:[#allocation2 + $0x2ac] ss:$16 sps:$4 sm:$0xff]  }
  0x81   :  { %1760 = vmatpush1.bf16.msra.mxu0 %v3270_v36  ;;  %1847 = vmatprep.subr.bf16.mxu1 %v3281_v40  ;;  %v3357_v36 = vld [vmem:[#allocation2 + $0x288] ss:$16 sps:$4 sm:$0xff]  }
  0x82   :  { %1761 = vmatprep.subr.bf16.mxu0 %v3278_v39  ;;  %v3360_v39 = vld [vmem:[#allocation2 + $0x6a0] ss:$16 sps:$4 sm:$0xff]   ;;  %v3363_v40 = vld [vmem:[#allocation2 + $0x2a8] ss:$16 sps:$4 sm:$0xff]  }
  0x84   :  { %1848 = vmatpush1.bf16.msra.mxu1 %v3279_v42  ;;  %v3371_v42 = vld [vmem:[#allocation2 + $0x2cc] ss:$16 sps:$4 sm:$0xff]  }
  0x85   :  { %1762 = vmatpush1.bf16.msra.mxu0 %v3276_v41  ;;  %1849 = vmatprep.subr.bf16.mxu1 %v3287_v44  ;;  %v3368_v41 = vld [vmem:[#allocation2 + $0x6c4] ss:$16 sps:$4 sm:$0xff]   ;;  %v3369_v44 = vld [vmem:[#allocation2 + $0x2c8] ss:$16 sps:$4 sm:$0xff]  }
  0x86   :  { %1763 = vmatprep.subr.bf16.mxu0 %v3284_v43  ;;  %v3366_v43 = vld [vmem:[#allocation2 + $0x6c0] ss:$16 sps:$4 sm:$0xff]  }
  0x88   :  { %1850 = vmatpush1.bf16.msra.mxu1 %v3285_v46  ;;  %v3377_v46 = vld [vmem:[#allocation2 + $0x2ec] ss:$16 sps:$4 sm:$0xff]  }
  0x89   :  { %1764 = vmatpush1.bf16.msra.mxu0 %v3282_v45  ;;  %1851 = vmatprep.subr.bf16.mxu1 %v3293_v48  ;;  %v3374_v45 = vld [vmem:[#allocation2 + $0x6e4] ss:$16 sps:$4 sm:$0xff]   ;;  %v3375_v48 = vld [vmem:[#allocation2 + $0x2e8] ss:$16 sps:$4 sm:$0xff]  }
  0x8a   :  { %1765 = vmatprep.subr.bf16.mxu0 %v3290_v47  ;;  %v3372_v47 = vld [vmem:[#allocation2 + $0x6e0] ss:$16 sps:$4 sm:$0xff]  }
  0x8c   :  { %1852 = vmatpush1.bf16.msra.mxu1 %v3291_v50  ;;  %v3383_v50 = vld [vmem:[#allocation2 + $0x30c] ss:$16 sps:$4 sm:$0xff]  }
  0x8d   :  { %1766 = vmatpush1.bf16.msra.mxu0 %v3288_v49  ;;  %1853 = vmatprep.subr.bf16.mxu1 %v3299_v52  ;;  %v3380_v49 = vld [vmem:[#allocation2 + $0x704] ss:$16 sps:$4 sm:$0xff]   ;;  %v3381_v52 = vld [vmem:[#allocation2 + $0x308] ss:$16 sps:$4 sm:$0xff]  }
  0x8e   :  { %1767 = vmatprep.subr.bf16.mxu0 %v3296_v51  ;;  %v3378_v51 = vld [vmem:[#allocation2 + $0x700] ss:$16 sps:$4 sm:$0xff]  }
  0x90   :  { %1854 = vmatpush1.bf16.msra.mxu1 %v3297_v54  ;;  %v3389_v54 = vld [vmem:[#allocation2 + $0x32c] ss:$16 sps:$4 sm:$0xff]  }
  0x91   :  { %1768 = vmatpush1.bf16.msra.mxu0 %v3294_v53  ;;  %1855 = vmatprep.subr.bf16.mxu1 %v3305_v57  ;;  %v3386_v53 = vld [vmem:[#allocation2 + $0x724] ss:$16 sps:$4 sm:$0xff]   ;;  %v3387_v57 = vld [vmem:[#allocation2 + $0x328] ss:$16 sps:$4 sm:$0xff]  }
  0x92   :  { %1769 = vmatprep.subr.bf16.mxu0 %v3302_v56  ;;  %v3384_v56 = vld [vmem:[#allocation2 + $0x720] ss:$16 sps:$4 sm:$0xff]  }
  0x94   :  { %1856 = vmatpush1.bf16.msra.mxu1 %v3303_v59  ;;  %v3395_v59 = vld [vmem:[#allocation2 + $0x34c] ss:$16 sps:$4 sm:$0xff]  }
  0x95   :  { %1770 = vmatpush1.bf16.msra.mxu0 %v3300_v58  ;;  %1857 = vmatprep.subr.bf16.mxu1 %v3311_v61  ;;  %v3392_v58 = vld [vmem:[#allocation2 + $0x744] ss:$16 sps:$4 sm:$0xff]   ;;  %v3393_v61 = vld [vmem:[#allocation2 + $0x348] ss:$16 sps:$4 sm:$0xff]  }
  0x96   :  { %1771 = vmatprep.subr.bf16.mxu0 %v3308_v60  ;;  %v3390_v60 = vld [vmem:[#allocation2 + $0x740] ss:$16 sps:$4 sm:$0xff]  }
  0x98   :  { %1858 = vmatpush1.bf16.msra.mxu1 %v3309_v63  ;;  %v3401_v63 = vld [vmem:[#allocation2 + $0x36c] ss:$16 sps:$4 sm:$0xff]  }
  0x99   :  { %1772 = vmatpush1.bf16.msra.mxu0 %v3306_v62  ;;  %1859 = vmatprep.subr.bf16.mxu1 %v3317_v1  ;;  %v3398_v62 = vld [vmem:[#allocation2 + $0x764] ss:$16 sps:$4 sm:$0xff]   ;;  %v3399_v1 = vld [vmem:[#allocation2 + $0x368] ss:$16 sps:$4 sm:$0xff]  }
  0x9a   :  { %1773 = vmatprep.subr.bf16.mxu0 %v3314_v0  ;;  %v3396_v0 = vld [vmem:[#allocation2 + $0x760] ss:$16 sps:$4 sm:$0xff]  }
  0x9c   :  { %1860 = vmatpush1.bf16.msra.mxu1 %v3315_v3  ;;  %v3407_v3 = vld [vmem:[#allocation2 + $0x38c] ss:$16 sps:$4 sm:$0xff]  }
  0x9d   :  { %1774 = vmatpush1.bf16.msra.mxu0 %v3312_v2  ;;  %1861 = vmatprep.subr.bf16.mxu1 %v3323_v5  ;;  %v3404_v2 = vld [vmem:[#allocation2 + $0x784] ss:$16 sps:$4 sm:$0xff]   ;;  %v3405_v5 = vld [vmem:[#allocation2 + $0x388] ss:$16 sps:$4 sm:$0xff]  }
  0x9e   :  { %1775 = vmatprep.subr.bf16.mxu0 %v3320_v4  ;;  %v3402_v4 = vld [vmem:[#allocation2 + $0x780] ss:$16 sps:$4 sm:$0xff]  }
  0xa0   :  { %1862 = vmatpush1.bf16.msra.mxu1 %v3321_v7  ;;  %v3413_v7 = vld [vmem:[#allocation2 + $0x3ac] ss:$16 sps:$4 sm:$0xff]  }
  0xa1   :  { %1776 = vmatpush1.bf16.msra.mxu0 %v3318_v6  ;;  %1863 = vmatprep.subr.bf16.mxu1 %v3329_v11  ;;  %v3410_v6 = vld [vmem:[#allocation2 + $0x7a4] ss:$16 sps:$4 sm:$0xff]   ;;  %v3411_v11 = vld [vmem:[#allocation2 + $0x3a8] ss:$16 sps:$4 sm:$0xff]  }
  0xa2   :  { %1777 = vmatprep.subr.bf16.mxu0 %v3326_v10  ;;  %v3408_v10 = vld [vmem:[#allocation2 + $0x7a0] ss:$16 sps:$4 sm:$0xff]  }
  0xa4   :  { %1864 = vmatpush1.bf16.msra.mxu1 %v3327_v13  ;;  %v3419_v13 = vld [vmem:[#allocation2 + $0x3cc] ss:$16 sps:$4 sm:$0xff]  }
  0xa5   :  { %1778 = vmatpush1.bf16.msra.mxu0 %v3324_v12  ;;  %1876 = vmatprep.subr.bf16.mxu1 %v3335_v15  ;;  %v3416_v12 = vld [vmem:[#allocation2 + $0x7c4] ss:$16 sps:$4 sm:$0xff]   ;;  %v3417_v15 = vld [vmem:[#allocation2 + $0x3c8] ss:$16 sps:$4 sm:$0xff]  }
  0xa6   :  { %1790 = vmatprep.subr.bf16.mxu0 %v3332_v14  ;;  %v3414_v14 = vld [vmem:[#allocation2 + $0x7c0] ss:$16 sps:$4 sm:$0xff]  }
  0xa7   :  { %1866 = vmatmul.mubr.bf16.vlgmr.msra.gmra.mrb[4].mxu1 %v3775_v8  ;;  %v3350_v8 = vld [vmem:[#allocation2 + $0x664] ss:$16 sps:$4 sm:$0xff]  }
  0xa8   :  { %1780 = vmatmul.mubr.bf16.vlgmr.msra.gmra.mrb[0].mxu0 %v3798_v16  ;;  %1877 = vmatpush1.bf16.msra.mxu1 %v3333_v18  ;;  %v3425_v18 = vld [vmem:[#allocation2 + $0x3ec] ss:$16 sps:$4 sm:$0xff]  }
  0xa9   :  { %1791 = vmatpush1.bf16.msra.mxu0 %v3330_v17  ;;  %1878 = vmatprep.subr.bf16.mxu1 %v3341_v20  ;;  %v3422_v17 = vld [vmem:[#allocation2 + $0x7e4] ss:$16 sps:$4 sm:$0xff]   ;;  %v3423_v20 = vld [vmem:[#allocation2 + $0x3e8] ss:$16 sps:$4 sm:$0xff]  }
  0xaa   :  { %1792 = vmatprep.subr.bf16.mxu0 %v3338_v19  ;;  %1822 = vmatprep.mubr.bf16.mxu0 %v3814_v25  ;;  %v3420_v19 = vld [vmem:[#allocation2 + $0x7e0] ss:$16 sps:$4 sm:$0xff]  }
  0xab   :  { %1908 = vmatprep.mubr.bf16.mxu1 %v3772_v55  ;;  %v3362_v55 = vld [vmem:[#allocation2 + $0x6a4] ss:$16 sps:$4 sm:$0xff]  }
  0xac   :  { %1879 = vmatpush1.bf16.msra.mxu1 %v3339_v24  ;;  %v3426_v24 = vld [vmem:[#allocation2 + $0x408] ss:$16 sps:$4 sm:$0xff]  }
  0xad   :  { %1793 = vmatpush1.bf16.msra.mxu0 %v3336_v23  ;;  %1880 = vmatprep.subr.bf16.mxu1 %v3347_v27  ;;  %v3428_v23 = vld [vmem:[#allocation2 + $0x40c] ss:$16 sps:$4 sm:$0xff]  }
  0xae   :  { %1794 = vmatprep.subr.bf16.mxu0 %v3344_v26  ;;  %v3820_v26 = vcombine.low %v3803_v21, %v3808_v22  ;;  %v3431_v27 = vld [vmem:[#allocation2 + $0x42c] ss:$16 sps:$4 sm:$0xff]   ;;  %v3525_v21 = vld [vmem:[#allocation4 + $0x10] ss:$8 sps:$4 sm:$0xff]  }
  0xaf   :  { %v3530_v22 = vld [vmem:[#allocation4 + $0x24] ss:$8 sps:$4 sm:$0xff]  }
  0xb0   :  { %1881 = vmatpush1.bf16.msra.mxu1 %v3345_v29  ;;  %v3524_v29 = vld [vmem:[#allocation4 + $0x4] ss:$8 sps:$4 sm:$0xff]  }
  0xb1   :  { %1795 = vmatpush1.bf16.msra.mxu0 %v3342_v28  ;;  %1882 = vmatprep.subr.bf16.mxu1 %v3353_v30  ;;  %v3522_v28 = vld [vmem:[#allocation4] ss:$8 sps:$4 sm:$0xff]   ;;  %v3527_v30 = vld [vmem:[#allocation4 + $0x14] ss:$8 sps:$4 sm:$0xff]  }
  0xb2   :  { %1796 = vmatprep.subr.bf16.mxu0 %v3350_v8  ;;  %v3429_v8 = vld [vmem:[#allocation2 + $0x428] ss:$16 sps:$4 sm:$0xff]  }
  0xb4   :  { %1883 = vmatpush1.bf16.msra.mxu1 %v3351_v32  ;;  %v3432_v32 = vld [vmem:[#allocation2 + $0x448] ss:$16 sps:$4 sm:$0xff]  }
  0xb5   :  { %1797 = vmatpush1.bf16.msra.mxu0 %v3348_v31  ;;  %1884 = vmatprep.subr.bf16.mxu1 %v3359_v34  ;;  %v3434_v31 = vld [vmem:[#allocation2 + $0x44c] ss:$16 sps:$4 sm:$0xff]   ;;  %v3435_v34 = vld [vmem:[#allocation2 + $0x468] ss:$16 sps:$4 sm:$0xff]  }
  0xb6   :  { %1798 = vmatprep.subr.bf16.mxu0 %v3356_v33  ;;  %v3437_v33 = vld [vmem:[#allocation2 + $0x46c] ss:$16 sps:$4 sm:$0xff]  }
  0xb8   :  { %1885 = vmatpush1.bf16.msra.mxu1 %v3357_v36  ;;  %v3533_v36 = vld [vmem:[#allocation4 + $0x34] ss:$8 sps:$4 sm:$0xff]  }
  0xb9   :  { %1799 = vmatpush1.bf16.msra.mxu0 %v3354_v35  ;;  %1886 = vmatprep.subr.bf16.mxu1 %v3365_v37  ;;  %v3440_v35 = vld [vmem:[#allocation2 + $0x48c] ss:$16 sps:$4 sm:$0xff]   ;;  %v3438_v37 = vld [vmem:[#allocation2 + $0x488] ss:$16 sps:$4 sm:$0xff]  }
  0xba   :  { %1800 = vmatprep.subr.bf16.mxu0 %v3362_v55  ;;  %v3536_v55 = vld [vmem:[#allocation4 + $0x44] ss:$8 sps:$4 sm:$0xff]  }
  0xbc   :  { %1887 = vmatpush1.bf16.msra.mxu1 %v3363_v40  ;;  %v3534_v40 = vld [vmem:[#allocation4 + $0x40] ss:$8 sps:$4 sm:$0xff]  }
  0xbd   :  { %1801 = vmatpush1.bf16.msra.mxu0 %v3360_v39  ;;  %1888 = vmatprep.subr.bf16.mxu1 %v3371_v42  ;;  %v3443_v39 = vld [vmem:[#allocation2 + $0x4ac] ss:$16 sps:$4 sm:$0xff]   ;;  %v3441_v42 = vld [vmem:[#allocation2 + $0x4a8] ss:$16 sps:$4 sm:$0xff]  }
  0xbe   :  { %1802 = vmatprep.subr.bf16.mxu0 %v3368_v41  ;;  %v3539_v41 = vld [vmem:[#allocation4 + $0x54] ss:$8 sps:$4 sm:$0xff]  }
  0xc0   :  { %1889 = vmatpush1.bf16.msra.mxu1 %v3369_v44  ;;  %v3537_v44 = vld [vmem:[#allocation4 + $0x50] ss:$8 sps:$4 sm:$0xff]  }
  0xc1   :  { %1803 = vmatpush1.bf16.msra.mxu0 %v3366_v43  ;;  %1890 = vmatprep.subr.bf16.mxu1 %v3377_v46  ;;  %v3446_v43 = vld [vmem:[#allocation2 + $0x4cc] ss:$16 sps:$4 sm:$0xff]   ;;  %v3444_v46 = vld [vmem:[#allocation2 + $0x4c8] ss:$16 sps:$4 sm:$0xff]  }
  0xc2   :  { %1804 = vmatprep.subr.bf16.mxu0 %v3374_v45  ;;  %v3542_v45 = vld [vmem:[#allocation4 + $0x64] ss:$8 sps:$4 sm:$0xff]  }
  0xc4   :  { %1891 = vmatpush1.bf16.msra.mxu1 %v3375_v48  ;;  %v3540_v48 = vld [vmem:[#allocation4 + $0x60] ss:$8 sps:$4 sm:$0xff]  }
  0xc5   :  { %1805 = vmatpush1.bf16.msra.mxu0 %v3372_v47  ;;  %1892 = vmatprep.subr.bf16.mxu1 %v3383_v50  ;;  %v3449_v47 = vld [vmem:[#allocation2 + $0x4ec] ss:$16 sps:$4 sm:$0xff]   ;;  %v3447_v50 = vld [vmem:[#allocation2 + $0x4e8] ss:$16 sps:$4 sm:$0xff]  }
  0xc6   :  { %1806 = vmatprep.subr.bf16.mxu0 %v3380_v49  ;;  %v3545_v49 = vld [vmem:[#allocation4 + $0x74] ss:$8 sps:$4 sm:$0xff]  }
  0xc8   :  { %1893 = vmatpush1.bf16.msra.mxu1 %v3381_v52  ;;  %v3543_v52 = vld [vmem:[#allocation4 + $0x70] ss:$8 sps:$4 sm:$0xff]  }
  0xc9   :  { %1807 = vmatpush1.bf16.msra.mxu0 %v3378_v51  ;;  %1894 = vmatprep.subr.bf16.mxu1 %v3389_v54  ;;  %v3452_v51 = vld [vmem:[#allocation2 + $0x50c] ss:$16 sps:$4 sm:$0xff]   ;;  %v3450_v54 = vld [vmem:[#allocation2 + $0x508] ss:$16 sps:$4 sm:$0xff]  }
  0xca   :  { %1808 = vmatprep.subr.bf16.mxu0 %v3386_v53  ;;  %v3548_v53 = vld [vmem:[#allocation4 + $0x84] ss:$8 sps:$4 sm:$0xff]  }
  0xcc   :  { %1895 = vmatpush1.bf16.msra.mxu1 %v3387_v57  ;;  %v3546_v57 = vld [vmem:[#allocation4 + $0x80] ss:$8 sps:$4 sm:$0xff]  }
  0xcd   :  { %1809 = vmatpush1.bf16.msra.mxu0 %v3384_v56  ;;  %1896 = vmatprep.subr.bf16.mxu1 %v3395_v59  ;;  %v3455_v56 = vld [vmem:[#allocation2 + $0x52c] ss:$16 sps:$4 sm:$0xff]   ;;  %v3453_v59 = vld [vmem:[#allocation2 + $0x528] ss:$16 sps:$4 sm:$0xff]  }
  0xce   :  { %1810 = vmatprep.subr.bf16.mxu0 %v3392_v58  ;;  %v3551_v58 = vld [vmem:[#allocation4 + $0x94] ss:$8 sps:$4 sm:$0xff]  }
  0xd0   :  { %1897 = vmatpush1.bf16.msra.mxu1 %v3393_v61  ;;  %v3549_v61 = vld [vmem:[#allocation4 + $0x90] ss:$8 sps:$4 sm:$0xff]  }
  0xd1   :  { %1811 = vmatpush1.bf16.msra.mxu0 %v3390_v60  ;;  %1898 = vmatprep.subr.bf16.mxu1 %v3401_v63  ;;  %v3458_v60 = vld [vmem:[#allocation2 + $0x54c] ss:$16 sps:$4 sm:$0xff]   ;;  %v3456_v63 = vld [vmem:[#allocation2 + $0x548] ss:$16 sps:$4 sm:$0xff]  }
  0xd2   :  { %1812 = vmatprep.subr.bf16.mxu0 %v3398_v62  ;;  %v3554_v62 = vld [vmem:[#allocation4 + $0xa4] ss:$8 sps:$4 sm:$0xff]  }
  0xd4   :  { %1899 = vmatpush1.bf16.msra.mxu1 %v3399_v1  ;;  %v3552_v1 = vld [vmem:[#allocation4 + $0xa0] ss:$8 sps:$4 sm:$0xff]  }
  0xd5   :  { %1813 = vmatpush1.bf16.msra.mxu0 %v3396_v0  ;;  %1900 = vmatprep.subr.bf16.mxu1 %v3407_v3  ;;  %v3461_v0 = vld [vmem:[#allocation2 + $0x56c] ss:$16 sps:$4 sm:$0xff]   ;;  %v3459_v3 = vld [vmem:[#allocation2 + $0x568] ss:$16 sps:$4 sm:$0xff]  }
  0xd6   :  { %1814 = vmatprep.subr.bf16.mxu0 %v3404_v2  ;;  %v3557_v2 = vld [vmem:[#allocation4 + $0xb4] ss:$8 sps:$4 sm:$0xff]  }
  0xd8   :  { %1901 = vmatpush1.bf16.msra.mxu1 %v3405_v5  ;;  %v3555_v5 = vld [vmem:[#allocation4 + $0xb0] ss:$8 sps:$4 sm:$0xff]  }
  0xd9   :  { %1815 = vmatpush1.bf16.msra.mxu0 %v3402_v4  ;;  %1902 = vmatprep.subr.bf16.mxu1 %v3413_v7  ;;  %v3464_v4 = vld [vmem:[#allocation2 + $0x58c] ss:$16 sps:$4 sm:$0xff]   ;;  %v3462_v7 = vld [vmem:[#allocation2 + $0x588] ss:$16 sps:$4 sm:$0xff]  }
  0xda   :  { %1816 = vmatprep.subr.bf16.mxu0 %v3410_v6  ;;  %v3560_v6 = vld [vmem:[#allocation4 + $0xc4] ss:$8 sps:$4 sm:$0xff]  }
  0xdc   :  { %1903 = vmatpush1.bf16.msra.mxu1 %v3411_v11  ;;  %v3558_v11 = vld [vmem:[#allocation4 + $0xc0] ss:$8 sps:$4 sm:$0xff]  }
  0xdd   :  { %1817 = vmatpush1.bf16.msra.mxu0 %v3408_v10  ;;  %1904 = vmatprep.subr.bf16.mxu1 %v3419_v13  ;;  %v3467_v10 = vld [vmem:[#allocation2 + $0x5ac] ss:$16 sps:$4 sm:$0xff]  }
  0xde   :  { %1818 = vmatprep.subr.bf16.mxu0 %v3416_v12  ;;  %v3465_v12 = vld [vmem:[#allocation2 + $0x5a8] ss:$16 sps:$4 sm:$0xff]   ;;  %v3470_v13 = vld [vmem:[#allocation2 + $0x5cc] ss:$16 sps:$4 sm:$0xff]  }
  0xe0   :  { %1905 = vmatpush1.bf16.msra.mxu1 %v3417_v15  ;;  %v3473_v15 = vld [vmem:[#allocation2 + $0x5ec] ss:$16 sps:$4 sm:$0xff]  }
  0xe1   :  { %1819 = vmatpush1.bf16.msra.mxu0 %v3414_v14  ;;  %1906 = vmatprep.subr.bf16.mxu1 %v3425_v18  ;;  %v3468_v14 = vld [vmem:[#allocation2 + $0x5c8] ss:$16 sps:$4 sm:$0xff]   ;;  %v3476_v18 = vld [vmem:[#allocation2 + $0x60c] ss:$16 sps:$4 sm:$0xff]  }
  0xe2   :  { %1820 = vmatprep.subr.bf16.mxu0 %v3422_v17  ;;  %v3471_v17 = vld [vmem:[#allocation2 + $0x5e8] ss:$16 sps:$4 sm:$0xff]  }
  0xe4   :  { %1907 = vmatpush1.bf16.msra.mxu1 %v3423_v20  ;;  %v3479_v20 = vld [vmem:[#allocation2 + $0x62c] ss:$16 sps:$4 sm:$0xff]  }
  0xe5   :  { %1821 = vmatpush1.bf16.msra.mxu0 %v3420_v19  ;;  %1919 = vmatprep.subr.bf16.mxu1 %v3428_v23  ;;  %v3474_v19 = vld [vmem:[#allocation2 + $0x608] ss:$16 sps:$4 sm:$0xff]  }
  0xe6   :  { %2429 = vmatprep.subr.bf16.mxu0 %v3524_v29  ;;  %v3477_v23 = vld [vmem:[#allocation2 + $0x628] ss:$16 sps:$4 sm:$0xff]  }
  0xe7   :  { %1909 = vmatmul.mubr.bf16.vlgmr.msra.gmra.mrb[4].mxu1 %v3777_v9  ;;  %v3528_v9 = vld [vmem:[#allocation4 + $0x20] ss:$8 sps:$4 sm:$0xff]  }
  0xe8   :  { %1823 = vmatmul.mubr.bf16.vlgmr.msra.gmra.mrb[0].mxu0 %v3820_v26  ;;  %1920 = vmatpush1.bf16.msra.mxu1 %v3426_v24  ;;  %v3482_v24 = vld [vmem:[#allocation2 + $0x64c] ss:$16 sps:$4 sm:$0xff]   ;;  %v3483_v29 = vld [vmem:[#allocation2 + $0x668] ss:$16 sps:$4 sm:$0xff]  }
  0xe9   :  { %1951 = vmatprep.mubr.bf16.mxu1 %v3793_v38  ;;  %1921 = vmatprep.subr.bf16.mxu1 %v3431_v27  ;;  %v3531_v38 = vld [vmem:[#allocation4 + $0x30] ss:$8 sps:$4 sm:$0xff]  }
  0xea   :  { %2430 = vmatpush1.bf16.msra.mxu0 %v3522_v28  ;;  %v3480_v27 = vld [vmem:[#allocation2 + $0x648] ss:$16 sps:$4 sm:$0xff]   ;;  %v3485_v28 = vld [vmem:[#allocation2 + $0x66c] ss:$16 sps:$4 sm:$0xff]  }
  0xeb   :  { %2431 = vmatprep.subr.bf16.mxu0 %v3527_v30  ;;  %v3486_v30 = vld [vmem:[#allocation2 + $0x688] ss:$16 sps:$4 sm:$0xff]  }
  0xec   :  { %1922 = vmatpush1.bf16.msra.mxu1 %v3429_v8  ;;  %v3488_v8 = vld [vmem:[#allocation2 + $0x68c] ss:$16 sps:$4 sm:$0xff]  }
  0xed   :  { %1923 = vmatprep.subr.bf16.mxu1 %v3434_v31  ;;  %v3491_v31 = vld [vmem:[#allocation2 + $0x6ac] ss:$16 sps:$4 sm:$0xff]  }
  0xee   :  { %2432 = vmatpush1.bf16.msra.mxu0 %v3525_v21  ;;  %v3563_v21 = vld [vmem:[#allocation4 + $0xd4] ss:$8 sps:$4 sm:$0xff]  }
  0xef   :  { %2433 = vmatprep.subr.bf16.mxu0 %v3530_v22  ;;  %v3494_v22 = vld [vmem:[#allocation2 + $0x6cc] ss:$16 sps:$4 sm:$0xff]  }
  0xf0   :  { %1924 = vmatpush1.bf16.msra.mxu1 %v3432_v32 }
  0xf1   :  { %1925 = vmatprep.subr.bf16.mxu1 %v3437_v33 }
  0xf2   :  { %2434 = vmatpush1.bf16.msra.mxu0 %v3528_v9  ;;  %v3492_v9 = vld [vmem:[#allocation2 + $0x6c8] ss:$16 sps:$4 sm:$0xff]  }
  0xf3   :  { %2435 = vmatprep.subr.bf16.mxu0 %v3533_v36 }
  0xf4   :  { %1926 = vmatpush1.bf16.msra.mxu1 %v3435_v34 }
  0xf5   :  { %1927 = vmatprep.subr.bf16.mxu1 %v3440_v35  ;;  %v3566_v35 = vld [vmem:[#allocation4 + $0xe4] ss:$8 sps:$4 sm:$0xff]  }
  0xf6   :  { %2436 = vmatpush1.bf16.msra.mxu0 %v3531_v38  ;;  %v3497_v38 = vld [vmem:[#allocation2 + $0x6ec] ss:$16 sps:$4 sm:$0xff]  }
  0xf7   :  { %2437 = vmatprep.subr.bf16.mxu0 %v3536_v55  ;;  %v3564_v55 = vld [vmem:[#allocation4 + $0xe0] ss:$8 sps:$4 sm:$0xff]  }
  0xf8   :  { %1928 = vmatpush1.bf16.msra.mxu1 %v3438_v37  ;;  %v3495_v37 = vld [vmem:[#allocation2 + $0x6e8] ss:$16 sps:$4 sm:$0xff]  }
  0xf9   :  { %1929 = vmatprep.subr.bf16.mxu1 %v3443_v39  ;;  %v3569_v39 = vld [vmem:[#allocation4 + $0xf4] ss:$8 sps:$4 sm:$0xff]  }
  0xfa   :  { %2438 = vmatpush1.bf16.msra.mxu0 %v3534_v40  ;;  %v3500_v40 = vld [vmem:[#allocation2 + $0x70c] ss:$16 sps:$4 sm:$0xff]  }
  0xfb   :  { %2439 = vmatprep.subr.bf16.mxu0 %v3539_v41  ;;  %v3567_v41 = vld [vmem:[#allocation4 + $0xf0] ss:$8 sps:$4 sm:$0xff]  }
  0xfc   :  { %1930 = vmatpush1.bf16.msra.mxu1 %v3441_v42  ;;  %v3498_v42 = vld [vmem:[#allocation2 + $0x708] ss:$16 sps:$4 sm:$0xff]  }
  0xfd   :  { %1931 = vmatprep.subr.bf16.mxu1 %v3446_v43  ;;  %v3503_v43 = vld [vmem:[#allocation2 + $0x72c] ss:$16 sps:$4 sm:$0xff]  }
  0xfe   :  { %2440 = vmatpush1.bf16.msra.mxu0 %v3537_v44  ;;  %v3572_v44 = vld [vmem:[#allocation4 + $0x104] ss:$8 sps:$4 sm:$0xff]  }
  0xff   :  { %2441 = vmatprep.subr.bf16.mxu0 %v3542_v45  ;;  %v3501_v45 = vld [vmem:[#allocation2 + $0x728] ss:$16 sps:$4 sm:$0xff]  }
 0x100   :  { %1932 = vmatpush1.bf16.msra.mxu1 %v3444_v46  ;;  %v3506_v46 = vld [vmem:[#allocation2 + $0x74c] ss:$16 sps:$4 sm:$0xff]  }
 0x101   :  { %1933 = vmatprep.subr.bf16.mxu1 %v3449_v47  ;;  %v3504_v47 = vld [vmem:[#allocation2 + $0x748] ss:$16 sps:$4 sm:$0xff]  }
 0x102   :  { %2442 = vmatpush1.bf16.msra.mxu0 %v3540_v48  ;;  %v3509_v48 = vld [vmem:[#allocation2 + $0x76c] ss:$16 sps:$4 sm:$0xff]  }
 0x103   :  { %2443 = vmatprep.subr.bf16.mxu0 %v3545_v49  ;;  %v3507_v49 = vld [vmem:[#allocation2 + $0x768] ss:$16 sps:$4 sm:$0xff]  }
 0x104   :  { %1934 = vmatpush1.bf16.msra.mxu1 %v3447_v50  ;;  %v3512_v50 = vld [vmem:[#allocation2 + $0x78c] ss:$16 sps:$4 sm:$0xff]  }
 0x105   :  { %1935 = vmatprep.subr.bf16.mxu1 %v3452_v51  ;;  %v3510_v51 = vld [vmem:[#allocation2 + $0x788] ss:$16 sps:$4 sm:$0xff]  }
 0x106   :  { %2444 = vmatpush1.bf16.msra.mxu0 %v3543_v52  ;;  %v3515_v52 = vld [vmem:[#allocation2 + $0x7ac] ss:$16 sps:$4 sm:$0xff]  }
 0x107   :  { %2445 = vmatprep.subr.bf16.mxu0 %v3548_v53  ;;  %v3513_v53 = vld [vmem:[#allocation2 + $0x7a8] ss:$16 sps:$4 sm:$0xff]  }
 0x108   :  { %1936 = vmatpush1.bf16.msra.mxu1 %v3450_v54  ;;  %v3518_v54 = vld [vmem:[#allocation2 + $0x7cc] ss:$16 sps:$4 sm:$0xff]  }
 0x109   :  { %1937 = vmatprep.subr.bf16.mxu1 %v3455_v56  ;;  %v3516_v56 = vld [vmem:[#allocation2 + $0x7c8] ss:$16 sps:$4 sm:$0xff]  }
 0x10a   :  { %2446 = vmatpush1.bf16.msra.mxu0 %v3546_v57  ;;  %v3521_v57 = vld [vmem:[#allocation2 + $0x7ec] ss:$16 sps:$4 sm:$0xff]  }
 0x10b   :  { %2447 = vmatprep.subr.bf16.mxu0 %v3551_v58  ;;  %v3519_v58 = vld [vmem:[#allocation2 + $0x7e8] ss:$16 sps:$4 sm:$0xff]  }
 0x10c   :  { %1938 = vmatpush1.bf16.msra.mxu1 %v3453_v59  ;;  %v321_v59 = vlaneseq }
 0x10d   :  { %1939 = vmatprep.subr.bf16.mxu1 %v3458_v60 }
 0x10e   :  { %2448 = vmatpush1.bf16.msra.mxu0 %v3549_v61  ;;  %v3834_v60 = vshrl.u32 %v321_v59, 7  ;;  %v3611_v59 = vld [vmem:[#allocation4 + $0x1d4] ss:$8 sps:$4 sm:$0xff]  }
 0x10f   :  { %2449 = vmatprep.subr.bf16.mxu0 %v3554_v62  ;;  %v3840_v62 = vld [vmem:[%s3922_s2] sm:$0xf] }
 0x110   :  { %1940 = vmatpush1.bf16.msra.mxu1 %v3456_v63  ;;  %v323_v61 = vsub.s32 0, %v3834_v60  ;;  %v327_v63 = vsub.s32 1, %v3834_v60 }
 0x111   :  { %1941 = vmatprep.subr.bf16.mxu1 %v3461_v0 }
 0x112   :  { %2450 = vmatpush1.bf16.msra.mxu0 %v3552_v1  ;;  %v324_v0 = vrot.slane %v3840_v62, %v323_v61 }
 0x113   :  { %2451 = vmatprep.subr.bf16.mxu0 %v3557_v2 }
 0x114   :  { %1942 = vmatpush1.bf16.msra.mxu1 %v3459_v3 }
 0x115   :  { %1943 = vmatprep.subr.bf16.mxu1 %v3464_v4 }
 0x116   :  { %2452 = vmatpush1.bf16.msra.mxu0 %v3555_v5 }
 0x117   :  { %2453 = vmatprep.subr.bf16.mxu0 %v3560_v6 }
 0x118   :  { %1944 = vmatpush1.bf16.msra.mxu1 %v3462_v7 }
 0x119   :  { %1945 = vmatprep.subr.bf16.mxu1 %v3467_v10 }
 0x11a   :  { %2454 = vmatpush1.bf16.msra.mxu0 %v3558_v11 }
 0x11b   :  { %2455 = vmatprep.subr.bf16.mxu0 %v3563_v21  ;;  %v3620_v21 = vld [vmem:[%s3925_s5 + $0x48] sm:$0xff]  }
 0x11c   :  { %1946 = vmatpush1.bf16.msra.mxu1 %v3465_v12 }
 0x11d   :  { %1947 = vmatprep.subr.bf16.mxu1 %v3470_v13 }
 0x120   :  { %1948 = vmatpush1.bf16.msra.mxu1 %v3468_v14 }
 0x121   :  { %1949 = vmatprep.subr.bf16.mxu1 %v3473_v15 }
 0x124   :  { %1950 = vmatpush1.bf16.msra.mxu1 %v3471_v17 }
 0x125   :  { %1962 = vmatprep.subr.bf16.mxu1 %v3476_v18 }
 0x127   :  { %1952 = vmatmul.mubr.bf16.vlgmr.msra.gmra.mrb[4].mxu1 %v3798_v16  ;;  %v3489_v16 = vld [vmem:[#allocation2 + $0x6a8] ss:$16 sps:$4 sm:$0xff]  }
 0x128   :  { %1963 = vmatpush1.bf16.msra.mxu1 %v3474_v19  ;;  %1994 = vmatprep.mubr.bf16.mxu1 %v3814_v25  ;;  %v3561_v25 = vld [vmem:[#allocation4 + $0xd0] ss:$8 sps:$4 sm:$0xff]  }
 0x129   :  { %1964 = vmatprep.subr.bf16.mxu1 %v3479_v20  ;;  %2456 = vmatpush1.bf16.msra.mxu0 %v3561_v25  ;;  %v3578_v25 = vld [vmem:[#allocation4 + $0x124] ss:$8 sps:$4 sm:$0xff]  }
 0x12a   :  { %2457 = vmatprep.subr.bf16.mxu0 %v3566_v35  ;;  %v3623_v35 = vld [vmem:[%s3925_s5 + $0x10] sm:$0xff]  }
 0x12c   :  { %1965 = vmatpush1.bf16.msra.mxu1 %v3477_v23 }
 0x12d   :  { %1966 = vmatprep.subr.bf16.mxu1 %v3482_v24  ;;  %2458 = vmatpush1.bf16.msra.mxu0 %v3564_v55  ;;  %v3584_v55 = vld [vmem:[#allocation4 + $0x144] ss:$8 sps:$4 sm:$0xff]  }
 0x12e   :  { %2459 = vmatprep.subr.bf16.mxu0 %v3569_v39  ;;  %v3626_v39 = vld [vmem:[%s3925_s5 + $0x60] sm:$0xff]  }
 0x130   :  { %1967 = vmatpush1.bf16.msra.mxu1 %v3480_v27 }
 0x131   :  { %1968 = vmatprep.subr.bf16.mxu1 %v3485_v28  ;;  %2460 = vmatpush1.bf16.msra.mxu0 %v3567_v41  ;;  %v3587_v41 = vld [vmem:[#allocation4 + $0x154] ss:$8 sps:$4 sm:$0xff]  }
 0x132   :  { %2472 = vmatprep.subr.bf16.mxu0 %v3572_v44  ;;  %v3590_v44 = vld [vmem:[#allocation4 + $0x164] ss:$8 sps:$4 sm:$0xff]  }
 0x134   :  { %1969 = vmatpush1.bf16.msra.mxu1 %v3483_v29 }
 0x135   :  { %1970 = vmatprep.subr.bf16.mxu1 %v3488_v8  ;;  %v3570_v8 = vld [vmem:[#allocation4 + $0x100] ss:$8 sps:$4 sm:$0xff]  }
 0x138   :  { %1971 = vmatpush1.bf16.msra.mxu1 %v3486_v30  ;;  %v3575_v30 = vld [vmem:[#allocation4 + $0x114] ss:$8 sps:$4 sm:$0xff]  }
 0x139   :  { %1972 = vmatprep.subr.bf16.mxu1 %v3491_v31  ;;  %v3618_v31 = vld [vmem:[%s3925_s5 + $0x40] sm:$0xff]  }
 0x13a   :  { %v3827_v32 = vpop.f32.mrb[0].mxu1 }
 0x13b   :  { %v3829_v33 = vpop.f32.mrb[1].mxu1  ;;  %v1696_v1 = vadd.f32 %v3827_v32, %v324_v0  ;;  %v3621_v32 = vld [vmem:[%s3925_s5 + $0x8] sm:$0xff]  }
 0x13c   :  { %v3831_v34 = vpop.f32.mrb[2].mxu1  ;;  %1973 = vmatpush1.bf16.msra.mxu1 %v3489_v16  ;;  %v3619_v16 = vld [vmem:[%s3925_s5] sm:$0xff]  }
 0x13d   :  { %v1701_v36 = vpop.f32.mrb[3].mxu1  ;;  %1974 = vmatprep.subr.bf16.mxu1 %v3494_v22  ;;  %v1700_v4 = vadd.f32 %v3831_v34, %v324_v0  ;;  %v3573_v22 = vld [vmem:[#allocation4 + $0x110] ss:$8 sps:$4 sm:$0xff]   ;;  %v3576_v34 = vld [vmem:[#allocation4 + $0x120] ss:$8 sps:$4 sm:$0xff]  }
 0x13e   :  { %v3609_v0 = vld [vmem:[#allocation4 + $0x1d0] ss:$8 sps:$4 sm:$0xff]  }
 0x140   :  { %1975 = vmatpush1.bf16.msra.mxu1 %v3492_v9  ;;  %v3581_v9 = vld [vmem:[#allocation4 + $0x134] ss:$8 sps:$4 sm:$0xff]  }
 0x141   :  { %1976 = vmatprep.subr.bf16.mxu1 %v3497_v38  ;;  %v3579_v38 = vld [vmem:[#allocation4 + $0x130] ss:$8 sps:$4 sm:$0xff]  }
 0x144   :  { %1977 = vmatpush1.bf16.msra.mxu1 %v3495_v37  ;;  %v3625_v37 = vld [vmem:[%s3925_s5 + $0x18] sm:$0xff]  }
 0x145   :  { %1978 = vmatprep.subr.bf16.mxu1 %v3500_v40  ;;  %v3582_v40 = vld [vmem:[#allocation4 + $0x140] ss:$8 sps:$4 sm:$0xff]  }
 0x148   :  { %1979 = vmatpush1.bf16.msra.mxu1 %v3498_v42  ;;  %v3627_v42 = vld [vmem:[%s3925_s5 + $0x20] sm:$0xff]  }
 0x149   :  { %1980 = vmatprep.subr.bf16.mxu1 %v3503_v43  ;;  %v3585_v43 = vld [vmem:[#allocation4 + $0x150] ss:$8 sps:$4 sm:$0xff]  }
 0x14c   :  { %1981 = vmatpush1.bf16.msra.mxu1 %v3501_v45  ;;  %v3588_v45 = vld [vmem:[#allocation4 + $0x160] ss:$8 sps:$4 sm:$0xff]  }
 0x14d   :  { %1982 = vmatprep.subr.bf16.mxu1 %v3506_v46  ;;  %v3593_v46 = vld [vmem:[#allocation4 + $0x174] ss:$8 sps:$4 sm:$0xff]  }
 0x150   :  { %1983 = vmatpush1.bf16.msra.mxu1 %v3504_v47  ;;  %v3591_v47 = vld [vmem:[#allocation4 + $0x170] ss:$8 sps:$4 sm:$0xff]  }
 0x151   :  { %1984 = vmatprep.subr.bf16.mxu1 %v3509_v48  ;;  %v3596_v48 = vld [vmem:[#allocation4 + $0x184] ss:$8 sps:$4 sm:$0xff]  }
 0x154   :  { %1985 = vmatpush1.bf16.msra.mxu1 %v3507_v49  ;;  %v3594_v49 = vld [vmem:[#allocation4 + $0x180] ss:$8 sps:$4 sm:$0xff]  }
 0x155   :  { %1986 = vmatprep.subr.bf16.mxu1 %v3512_v50  ;;  %v3599_v50 = vld [vmem:[#allocation4 + $0x194] ss:$8 sps:$4 sm:$0xff]  }
 0x158   :  { %1987 = vmatpush1.bf16.msra.mxu1 %v3510_v51  ;;  %v3597_v51 = vld [vmem:[#allocation4 + $0x190] ss:$8 sps:$4 sm:$0xff]  }
 0x159   :  { %1988 = vmatprep.subr.bf16.mxu1 %v3515_v52  ;;  %v3602_v52 = vld [vmem:[#allocation4 + $0x1a4] ss:$8 sps:$4 sm:$0xff]  }
 0x15c   :  { %1989 = vmatpush1.bf16.msra.mxu1 %v3513_v53  ;;  %v3600_v53 = vld [vmem:[#allocation4 + $0x1a0] ss:$8 sps:$4 sm:$0xff]  }
 0x15d   :  { %1990 = vmatprep.subr.bf16.mxu1 %v3518_v54  ;;  %v3605_v54 = vld [vmem:[#allocation4 + $0x1b4] ss:$8 sps:$4 sm:$0xff]  }
 0x160   :  { %1991 = vmatpush1.bf16.msra.mxu1 %v3516_v56  ;;  %v3603_v56 = vld [vmem:[#allocation4 + $0x1b0] ss:$8 sps:$4 sm:$0xff]  }
 0x161   :  { %1992 = vmatprep.subr.bf16.mxu1 %v3521_v57  ;;  %v3608_v57 = vld [vmem:[#allocation4 + $0x1c4] ss:$8 sps:$4 sm:$0xff]  }
 0x164   :  { %1993 = vmatpush1.bf16.msra.mxu1 %v3519_v58  ;;  %v3606_v58 = vld [vmem:[#allocation4 + $0x1c0] ss:$8 sps:$4 sm:$0xff]  }
 0x165   :  { %3070 = vmatprep.subr.bf16.mxu1 %v3618_v31  ;;  %v3628_v31 = vld [vmem:[%s3925_s5 + $0x68] sm:$0xff]  }
 0x167   :  { %1995 = vmatmul.mubr.bf16.vlgmr.msra.gmra.mrb[4].mxu1 %v3820_v26  ;;  %v328_v26 = vrot.slane %v3840_v62, %v327_v63 }
 0x168   :  { %3071 = vmatpush3.bf16.msra.mxu1 %v3619_v16  ;;  %v3629_v16 = vld [vmem:[%s3925_s5 + $0x28] sm:$0xff]  }
 0x169   :  { %v1698_v2 = vadd.f32 %v3829_v33, %v328_v26  ;;  %v1702_v7 = vadd.f32 %v1701_v36, %v328_v26  ;;  %3072 = vmatprep.subr.bf16.mxu1 %v3620_v21  ;;  %v3622_v33 = vld [vmem:[%s3925_s5 + $0x50] sm:$0xff]   ;;  %v3624_v36 = vld [vmem:[%s3925_s5 + $0x58] sm:$0xff]   ;;  %v3614_v26 = vld [vmem:[#allocation4 + $0x1e4] ss:$8 sps:$4 sm:$0xff]  }
 0x16a   :  { %v3630_v21 = vld [vmem:[%s3925_s5 + $0x70] sm:$0xff]  }
 0x16c   :  { %3073 = vmatpush3.bf16.msra.mxu1 %v3621_v32  ;;  %v3633_v32 = vld [vmem:[%s3925_s5 + $0x38] sm:$0xff]  }
 0x16d   :  { %3074 = vmatprep.subr.bf16.mxu1 %v3622_v33  ;;  %v2097_v33 = vld [vmem:[%s3924_s4] sm:$0x3] }
 0x170   :  { %3075 = vmatpush3.bf16.msra.mxu1 %v3623_v35 }
 0x171   :  { %3076 = vmatprep.subr.bf16.mxu1 %v3624_v36 }
 0x174   :  { %3077 = vmatpush3.bf16.msra.mxu1 %v3625_v37 }
 0x175   :  { %3078 = vmatprep.subr.bf16.mxu1 %v3626_v39 }
 0x178   :  { %3079 = vmatpush3.bf16.msra.mxu1 %v3627_v42 }
 0x179   :  { %3080 = vmatprep.subr.bf16.mxu1 %v3628_v31 }
 0x17c   :  { %3081 = vmatpush3.bf16.msra.mxu1 %v3629_v16 }
 0x17d   :  { %3082 = vmatprep.subr.bf16.mxu1 %v3630_v21 }
 0x1bb   :  { %v1824_v3 = vpop.f32.mrb[0].mxu0 }
 0x1bc   :  { %v3093_v5 = vadd.f32 %v1824_v3, %v1696_v1  ;;  %v1826_v6 = vpop.f32.mrb[1].mxu0  ;;  %v3612_v1 = vld [vmem:[#allocation4 + $0x1e0] ss:$8 sps:$4 sm:$0xff]   ;;  %v3615_v3 = vld [vmem:[#allocation4 + $0x1f0] ss:$8 sps:$4 sm:$0xff]  }
 0x1bd   :  { %v3095_v10 = vadd.f32 %v1826_v6, %v1698_v2  ;;  %v1828_v11 = vpop.f32.mrb[2].mxu0  ;;  %v3617_v2 = vld [vmem:[#allocation4 + $0x1f4] ss:$8 sps:$4 sm:$0xff]  }
 0x1be   :  { %v2013_v12 = vmul.f32 0.2, %v3093_v5  ;;  %v3097_v13 = vadd.f32 %v1828_v11, %v1700_v4  ;;  %v1830_v14 = vpop.f32.mrb[3].mxu0  ;;  %vm2005_vm0 = vcmp.ge.f32.partialorder %v3093_v5, 0.0  ;;  %v331_v4 = vsub.s32 2, %v3834_v60 }
 0x1bf   :  { %v2014_v15 = vmul.f32 0.2, %v3095_v10  ;;  %v3099_v17 = vadd.f32 %v1830_v14, %v1702_v7  ;;  %vm2006_vm1 = vcmp.ge.f32.partialorder %v3095_v10, 0.0 }
 0x1c0   :  { %vm2009_vm2 = vcmp.ge.f32.partialorder %v3097_v13, 0.0  ;;  %v2017_v18 = vmul.f32 0.2, %v3097_v13  ;;  %v2021_v20 = vsel %vm2005_vm0, %v3093_v5, %v2013_v12  ;;  %v335_v5 = vsub.s32 3, %v3834_v60 }
 0x1c1   :  { %vm2010_vm3 = vcmp.ge.f32.partialorder %v3099_v17, 0.0  ;;  %v2018_v19 = vmul.f32 0.2, %v3099_v17  ;;  %v2022_v27 = vsel %vm2006_vm1, %v3095_v10, %v2014_v15  ;;  %v332_v6 = vrot.slane %v3840_v62, %v331_v4 }
 0x1c2   :  { %v2025_v23 = vsel %vm2009_vm2, %v3097_v13, %v2017_v18  ;;  %v336_v7 = vrot.slane %v3840_v62, %v335_v5 }
 0x1c3   :  { %v2029_v24 = vpack.c.bf16 %v2025_v23, %v2021_v20  ;;  %v2026_v28 = vsel %vm2010_vm3, %v3099_v17, %v2018_v19 }
 0x1c4   :  { %v2030_v29 = vpack.c.bf16 %v2026_v28, %v2022_v27 }
 0x1c6   :  { %2461 = vmatprep.mubr.bf16.mxu0 %v2030_v29 }
 0x1c7   :  { %2462 = vmatmul.mubr.bf16.vlgmr.msra.gmra.mrb[4].mxu0 %v2029_v24 }
 0x1c8   :  { %2473 = vmatpush1.bf16.msra.mxu0 %v3570_v8 }
 0x1c9   :  { %2474 = vmatprep.subr.bf16.mxu0 %v3575_v30 }
 0x1cc   :  { %2475 = vmatpush1.bf16.msra.mxu0 %v3573_v22  ;;  %v3631_v22 = vld [vmem:[%s3925_s5 + $0x30] sm:$0xff]  }
 0x1cd   :  { %2476 = vmatprep.subr.bf16.mxu0 %v3578_v25  ;;  %3083 = vmatpush3.bf16.msra.mxu1 %v3631_v22  ;;  %v3632_v25 = vld [vmem:[%s3925_s5 + $0x78] sm:$0xff]  }
 0x1ce   :  { %3084 = vmatprep.subr.bf16.mxu1 %v3632_v25 }
 0x1d0   :  { %2477 = vmatpush1.bf16.msra.mxu0 %v3576_v34  ;;  %v2102_v34 = vrot.slane %v2097_v33, %v323_v61 }
 0x1d1   :  { %2478 = vmatprep.subr.bf16.mxu0 %v3581_v9  ;;  %3085 = vmatpush3.bf16.msra.mxu1 %v3633_v32  ;;  %v2106_v9 = vrot.slane %v2097_v33, %v327_v63 }
 0x1d4   :  { %2479 = vmatpush1.bf16.msra.mxu0 %v3579_v38 }
 0x1d5   :  { %2480 = vmatprep.subr.bf16.mxu0 %v3584_v55 }
 0x1d8   :  { %2481 = vmatpush1.bf16.msra.mxu0 %v3582_v40 }
 0x1d9   :  { %2482 = vmatprep.subr.bf16.mxu0 %v3587_v41 }
 0x1dc   :  { %2483 = vmatpush1.bf16.msra.mxu0 %v3585_v43 }
 0x1dd   :  { %2484 = vmatprep.subr.bf16.mxu0 %v3590_v44 }
 0x1e0   :  { %2485 = vmatpush1.bf16.msra.mxu0 %v3588_v45 }
 0x1e1   :  { %2486 = vmatprep.subr.bf16.mxu0 %v3593_v46 }
 0x1e4   :  { %2487 = vmatpush1.bf16.msra.mxu0 %v3591_v47 }
 0x1e5   :  { %2488 = vmatprep.subr.bf16.mxu0 %v3596_v48 }
 0x1e8   :  { %2489 = vmatpush1.bf16.msra.mxu0 %v3594_v49 }
 0x1e9   :  { %2490 = vmatprep.subr.bf16.mxu0 %v3599_v50  ;;  %v3053_v50 = vld [vmem:[%s3926_s6] ss:$0 sm:$0xff] }
 0x1ec   :  { %2491 = vmatpush1.bf16.msra.mxu0 %v3597_v51 }
 0x1ed   :  { %2492 = vmatprep.subr.bf16.mxu0 %v3602_v52 }
 0x1f0   :  { %2493 = vmatpush1.bf16.msra.mxu0 %v3600_v53 }
 0x1f1   :  { %2494 = vmatprep.subr.bf16.mxu0 %v3605_v54 }
 0x1f4   :  { %2495 = vmatpush1.bf16.msra.mxu0 %v3603_v56 }
 0x1f5   :  { %2496 = vmatprep.subr.bf16.mxu0 %v3608_v57 }
 0x1f8   :  { %2497 = vmatpush1.bf16.msra.mxu0 %v3606_v58 }
 0x1f9   :  { %2498 = vmatprep.subr.bf16.mxu0 %v3611_v59 }
 0x1fc   :  { %2499 = vmatpush1.bf16.msra.mxu0 %v3609_v0 }
 0x1fd   :  { %2500 = vmatprep.subr.bf16.mxu0 %v3614_v26 }
 0x200   :  { %2501 = vmatpush1.bf16.msra.mxu0 %v3612_v1 }
 0x201   :  { %2502 = vmatprep.subr.bf16.mxu0 %v3617_v2 }
 0x204   :  { %2503 = vmatpush1.bf16.msra.mxu0 %v3615_v3 }
 0x23a   :  { %v1996_v10 = vpop.f32.mrb[4].mxu1 }
 0x23b   :  { %v3100_v11 = vadd.f32 %v1996_v10, %v332_v6  ;;  %v1998_v12 = vpop.f32.mrb[5].mxu1 }
 0x23c   :  { %v3101_v13 = vadd.f32 %v1998_v12, %v336_v7  ;;  %v2000_v14 = vpop.f32.mrb[6].mxu1 }
 0x23d   :  { %v2015_v15 = vmul.f32 0.2, %v3100_v11  ;;  %v3102_v17 = vadd.f32 %v2000_v14, %v332_v6  ;;  %v2002_v18 = vpop.f32.mrb[7].mxu1  ;;  %vm2007_vm4 = vcmp.ge.f32.partialorder %v3100_v11, 0.0 }
 0x23e   :  { %v2016_v19 = vmul.f32 0.2, %v3101_v13  ;;  %v3103_v20 = vadd.f32 %v2002_v18, %v336_v7  ;;  %vm2008_vm5 = vcmp.ge.f32.partialorder %v3101_v13, 0.0 }
 0x23f   :  { %vm2011_vm6 = vcmp.ge.f32.partialorder %v3102_v17, 0.0  ;;  %v2019_v23 = vmul.f32 0.2, %v3102_v17  ;;  %v2023_v27 = vsel %vm2007_vm4, %v3100_v11, %v2015_v15 }
 0x240   :  { %vm2012_vm7 = vcmp.ge.f32.partialorder %v3103_v20, 0.0  ;;  %v2020_v24 = vmul.f32 0.2, %v3103_v20  ;;  %v2024_v62 = vsel %vm2008_vm5, %v3101_v13, %v2016_v19 }
 0x241   :  { %v2027_v28 = vsel %vm2011_vm6, %v3102_v17, %v2019_v23 }
 0x242   :  { %v2031_v29 = vpack.c.bf16 %v2027_v28, %v2023_v27  ;;  %v2028_v8 = vsel %vm2012_vm7, %v3103_v20, %v2020_v24 }
 0x243   :  { %v2032_v30 = vpack.c.bf16 %v2028_v8, %v2024_v62 }
 0x245   :  { %2504 = vmatprep.mubr.bf16.mxu0 %v2032_v30 }
 0x246   :  { %2505 = vmatmul.mubr.bf16.vlgmr.msra.gmra.mrb[4].mxu0 %v2031_v29 }
 0x319   :  { %v2506_v35 = vpop.f32.mrb[4].mxu0 }
 0x31a   :  { %v3104_v36 = vadd.f32 %v2506_v35, %v2102_v34  ;;  %v2508_v38 = vpop.f32.mrb[5].mxu0 }
 0x31b   :  { %v3105_v55 = vadd.f32 %v2508_v38, %v2106_v9  ;;  %v2510_v37 = vpop.f32.mrb[6].mxu0 }
 0x31c   :  { %v2519_v39 = vmul.f32 0.2, %v3104_v36  ;;  %v3106_v40 = vadd.f32 %v2510_v37, %v2102_v34  ;;  %v2512_v41 = vpop.f32.mrb[7].mxu0  ;;  %vm2515_vm8 = vcmp.ge.f32.partialorder %v3104_v36, 0.0 }
 0x31d   :  { %v2520_v42 = vmul.f32 0.2, %v3105_v55  ;;  %v3107_v43 = vadd.f32 %v2512_v41, %v2106_v9  ;;  %vm2516_vm9 = vcmp.ge.f32.partialorder %v3105_v55, 0.0 }
 0x31e   :  { %vm2517_vm10 = vcmp.ge.f32.partialorder %v3106_v40, 0.0  ;;  %v2521_v44 = vmul.f32 0.2, %v3106_v40  ;;  %v2523_v61 = vsel %vm2515_vm8, %v3104_v36, %v2519_v39 }
 0x31f   :  { %vm2518_vm11 = vcmp.ge.f32.partialorder %v3107_v43, 0.0  ;;  %v2522_v45 = vmul.f32 0.2, %v3107_v43  ;;  %v2524_v63 = vsel %vm2516_vm9, %v3105_v55, %v2520_v42 }
 0x320   :  { %v2525_v46 = vsel %vm2517_vm10, %v3106_v40, %v2521_v44 }
 0x321   :  { %v2527_v60 = vpack.c.bf16 %v2525_v46, %v2523_v61  ;;  %v2526_v47 = vsel %vm2518_vm11, %v3107_v43, %v2522_v45 }
 0x322   :  { %v2528_v48 = vpack.c.bf16 %v2526_v47, %v2524_v63 }
 0x324   :  { %2696 = vmatprep.mubr.bf16.mxu1 %v2528_v48 }
 0x325   :  { %2697 = vmatmul.mubr.bf16.vlgmr.msra.gmra.mrb[8].mxu1 %v2527_v60 }
 0x3f8   :  { %v3086_v49 = vpop.f32.mrb[8].mxu1 }
 0x3f9   :  { %v3087_v51 = vpop.f32.mrb[9].mxu1 }
 0x3fa   :  { %v3088_v52 = vadd.f32 %v3087_v51, %v3086_v49  ;;  %v3089_v53 = vpop.f32.mrb[10].mxu1 }
 0x3fb   :  { %v3090_v54 = vpop.f32.mrb[11].mxu1 }
 0x3fc   :  { %v2699_v56 = vadd.f32 %v3088_v52, %v3053_v50  ;;  %v3091_v57 = vadd.f32 %v3090_v54, %v3089_v53 }
 0x3fe   :  { %v2705_v58 = vsub.f32 0.0, %v2699_v56  ;;  %v2702_v59 = vadd.f32 %v3091_v57, %v3053_v50 }
 0x400   :  { %v2707_v0 = vmul.f32 1.442695, %v2705_v58  ;;  %v2706_v26 = vsub.f32 0.0, %v2702_v59 }
 0x402   :  { %3634 = vpow2.f32 %v2707_v0  ;;  %v2709_v1 = vmul.f32 1.442695, %v2706_v26 }
 0x404   :  { %3636 = vpow2.f32 %v2709_v1 }
 0x40c   :  { %v3635_v2 = vpop.eup %3634 }
 0x40d   :  { %v2711_v3 = vadd.f32 1.0, %v3635_v2 }
 0x40e   :  { %v3637_v4 = vpop.eup %3636 }
 0x40f   :  { %3638 = vrcp.f32 %v2711_v3  ;;  %v2712_v5 = vadd.f32 1.0, %v3637_v4 }
 0x411   :  { %3640 = vrcp.f32 %v2712_v5 }
 0x419   :  { %v3639_v6 = vpop.eup %3638 }
 0x41a   :  { %2717 = vst [vmem:[%s3927_s7] sm:$0xff] %v3639_v6 }
 0x41b   :  { %v3641_v7 = vpop.eup %3640 }
 0x41c   :  { %2718 = vst [vmem:[%s3927_s7 + $0x8] sm:$0xff] %v3641_v7 }
 0x41d   :  { %2723 = vsyncpa [#allocation3], 1 }
 0x41e   :  { %2724 = vsyncpa [#allocation5], 1 }

</bundles_post_ra>
